<compile_context>
chip_gen: v5e
topology: v5e:2x2
jax: 0.10.0
libtpu: 0.0.40
codegen_flags: <defaults>
</compile_context>

<pallas_src>
import math
import functools

import jax
import jax.numpy as jnp
from jax.experimental import pallas as pl
from jax.experimental.pallas import tpu as pltpu


# ----------------------------------------------------------------------------
# Kernel 1: dense projection  y = x @ W^T + b  (fused fwd+bwd input-to-gate
# projection, lane-dense 8H-wide output), row-tiled grid.
# ----------------------------------------------------------------------------
def _dense_kernel(x_ref, w_t_ref, b_ref, o_ref):
    o_ref[...] = (
        jnp.dot(x_ref[...], w_t_ref[...], preferred_element_type=jnp.float32)
        + b_ref[...]
    )


def dense(x, w, b):
    """x: (N, I), w: (O, I), b: (O,) -> (N, O) float32."""
    n, i = x.shape
    o = w.shape[0]
    if n <= 512:
        bm = n
    elif n % 256 == 0:
        bm = 256
    elif n % 128 == 0:
        bm = 128
    elif n % 8 == 0:
        bm = 8
    else:
        bm = n
    return pl.pallas_call(
        _dense_kernel,
        out_shape=jax.ShapeDtypeStruct((n, o), jnp.float32),
        grid_spec=pltpu.PrefetchScalarGridSpec(
            num_scalar_prefetch=0,
            grid=(n // bm,),
            in_specs=[
                pl.BlockSpec((bm, i), lambda r: (r, 0)),
                pl.BlockSpec((i, o), lambda r: (0, 0)),
                pl.BlockSpec((1, o), lambda r: (0, 0)),
            ],
            out_specs=pl.BlockSpec((bm, o), lambda r: (r, 0)),
        ),
        compiler_params=pltpu.CompilerParams(
            dimension_semantics=("parallel",)),
    )(x, w.T, b.reshape(1, o))


# ----------------------------------------------------------------------------
# Kernel 2: fused bidirectional LSTM recurrence.
# Grid = (direction, T // U); U timesteps unrolled per grid step.
# Gate layout inside xproj / w_hh is (i, f, o, g)  (reordered in the wrapper).
# ----------------------------------------------------------------------------
def _bilstm_kernel(xproj_ref, w_hh_ref, h0_ref, c0_ref,
                   h_all_ref, hn_ref, cn_ref, h_scr, c_scr,
                   *, hidden, unroll):
    H, U = hidden, unroll
    d = pl.program_id(0)
    t = pl.program_id(1)
    n_t = pl.num_programs(1)
    fwd = d == 0

    @pl.when(t == 0)
    def _():
        h_scr[...] = h0_ref[0]
        c_scr[...] = c0_ref[0]

    w_hh = w_hh_ref[0]            # (H, 4H)
    xall = xproj_ref[...]         # (B, U, 4H)   (time order = original order)
    h = h_scr[...]
    c = c_scr[...]

    hs = []
    for u in range(U):
        # forward walks the block 0..U-1; backward walks U-1..0
        x_u = jnp.where(fwd, xall[:, u, :], xall[:, U - 1 - u, :])
        gates = x_u + jnp.dot(h, w_hh, preferred_element_type=jnp.float32)
        sig = jax.nn.sigmoid(gates[:, : 3 * H])     # (i, f, o) in one shot
        g_g = jnp.tanh(gates[:, 3 * H:])
        i_g = sig[:, 0:H]
        f_g = sig[:, H:2 * H]
        o_g = sig[:, 2 * H:3 * H]
        c = f_g * c + i_g * g_g
        h = o_g * jnp.tanh(c)
        hs.append(h)

    h_scr[...] = h
    c_scr[...] = c

    # Store hidden states at their original time positions within the block.
    h_block = jnp.stack(
        [jnp.where(fwd, hs[p], hs[U - 1 - p]) for p in range(U)], axis=1)
    h_all_ref[0] = h_block        # (B, U, H)

    @pl.when(t == n_t - 1)
    def _():
        hn_ref[0] = h
        cn_ref[0] = c


def bilstm(xproj, w_hh_t, h0, c0, hidden, unroll):
    """xproj: (B, T, 8H) with fwd gates in [:4H], bwd in [4H:];
    w_hh_t: (2, H, 4H); h0/c0: (2, B, H).
    Returns h_all (2, B, T, H), hn (2, B, H), cn (2, B, H)."""
    B, T, _ = xproj.shape
    H, U = hidden, unroll
    n_t = T // U
    kernel = functools.partial(_bilstm_kernel, hidden=H, unroll=U)
    return pl.pallas_call(
        kernel,
        out_shape=(
            jax.ShapeDtypeStruct((2, B, T, H), jnp.float32),
            jax.ShapeDtypeStruct((2, B, H), jnp.float32),
            jax.ShapeDtypeStruct((2, B, H), jnp.float32),
        ),
        grid_spec=pltpu.PrefetchScalarGridSpec(
            num_scalar_prefetch=0,
            grid=(2, n_t),
            in_specs=[
                # fwd reads time block t, bwd reads block n_t-1-t; the last
                # block-dim index d picks that direction's 4H gate columns.
                pl.BlockSpec((B, U, 4 * H),
                             lambda d, t: (0, t + d * (n_t - 1 - 2 * t), d)),
                pl.BlockSpec((1, H, 4 * H), lambda d, t: (d, 0, 0)),
                pl.BlockSpec((1, B, H), lambda d, t: (d, 0, 0)),
                pl.BlockSpec((1, B, H), lambda d, t: (d, 0, 0)),
            ],
            out_specs=[
                pl.BlockSpec((1, B, U, H),
                             lambda d, t: (d, 0, t + d * (n_t - 1 - 2 * t), 0)),
                pl.BlockSpec((1, B, H), lambda d, t: (d, 0, 0)),
                pl.BlockSpec((1, B, H), lambda d, t: (d, 0, 0)),
            ],
            scratch_shapes=[
                pltpu.VMEM((B, H), jnp.float32),
                pltpu.VMEM((B, H), jnp.float32),
            ],
        ),
        compiler_params=pltpu.CompilerParams(
            dimension_semantics=("parallel", "arbitrary")),
    )(xproj, w_hh_t, h0, c0)


# ----------------------------------------------------------------------------
# Kernel 3: single-head self-attention (Q=K=V=x) + out-proj + LeakyReLU(0.1).
# Whole batch in one call; fused QKV matmul; mask built in-kernel.
# ----------------------------------------------------------------------------
def _attn_kernel(x_ref, wqkv_ref, bqkv_ref, wo_ref, bo_ref,
                 mask_bt_ref, mask_flat_ref, out_ref,
                 *, batch, seq, embed, scale, neg_slope):
    B, T, E = batch, seq, embed
    x = x_ref[...]                                     # (B*T, E)
    qkv = (jnp.dot(x, wqkv_ref[...], preferred_element_type=jnp.float32)
           + bqkv_ref[...])                            # (B*T, 3E)
    q = qkv[:, :E] * scale
    k = qkv[:, E:2 * E]
    v = qkv[:, 2 * E:]

    row_ids = jax.lax.broadcasted_iota(jnp.int32, (T, T), 0)
    col_ids = jax.lax.broadcasted_iota(jnp.int32, (T, T), 1)
    diag = row_ids == col_ids

    ctx_parts = []
    for b in range(B):                                 # B is small & static
        qb = q[b * T:(b + 1) * T, :]
        kb = k[b * T:(b + 1) * T, :]
        vb = v[b * T:(b + 1) * T, :]
        row_valid = mask_flat_ref[b * T:(b + 1) * T, :] != 0.0   # (T, 1)
        col_valid = mask_bt_ref[b:b + 1, :] != 0.0               # (1, T)
        allowed = jnp.logical_or(jnp.logical_and(row_valid, col_valid), diag)

        s = jnp.dot(qb, kb.T, preferred_element_type=jnp.float32)
        s = jnp.where(allowed, s, -1e30)
        s_max = jnp.max(s, axis=-1, keepdims=True)
        p = jnp.exp(s - s_max)
        denom = jnp.sum(p, axis=-1, keepdims=True)
        ctx = jnp.dot(p, vb, preferred_element_type=jnp.float32)
        ctx = ctx * pl.reciprocal(denom, approx=True)  # normalize after P@V
        ctx_parts.append(ctx)

    ctx_all = jnp.concatenate(ctx_parts, axis=0)       # (B*T, E)
    o = (jnp.dot(ctx_all, wo_ref[...], preferred_element_type=jnp.float32)
         + bo_ref[...])
    out_ref[...] = jnp.where(o > 0, o, neg_slope * o)  # LeakyReLU(0.1)


def attention_leakyrelu(x2d, binary_mask, in_proj_w, in_proj_b,
                        out_proj_w, out_proj_b, *, batch, seq,
                        num_heads=1, neg_slope=0.1):
    """x2d: (B*T, E); binary_mask: (B, T)."""
    assert num_heads == 1, "kernel implements single-head attention only"
    E = x2d.shape[1]
    scale = 1.0 / math.sqrt(E // num_heads)
    mask_bt = binary_mask.astype(jnp.float32)                 # (B, T)
    mask_flat = mask_bt.reshape(batch * seq, 1)               # (B*T, 1)
    kernel = functools.partial(_attn_kernel, batch=batch, seq=seq, embed=E,
                               scale=scale, neg_slope=neg_slope)
    # TODO(synk): for long sequences this holds the full (T,T) scores in VMEM;
    # a flash-style KV-tiled variant would be needed on v7x at large T.
    return pl.pallas_call(
        kernel,
        out_shape=jax.ShapeDtypeStruct((batch * seq, E), jnp.float32),
    )(x2d, in_proj_w.T, in_proj_b.reshape(1, 3 * E),
      out_proj_w.T, out_proj_b.reshape(1, E), mask_bt, mask_flat)


# ----------------------------------------------------------------------------
# Full forward pass == GlobalInformationExtractor.forward (eval mode)
# ----------------------------------------------------------------------------
def _reorder_gates(a):
    """PyTorch LSTM gate order (i,f,g,o) -> kernel order (i,f,o,g) along dim 0."""
    i_, f_, g_, o_ = jnp.split(a, 4, axis=0)
    return jnp.concatenate([i_, f_, o_, g_], axis=0)


def global_information_extractor(x, binary_mask, params, *, hidden_size,
                                 num_heads=1, unroll=8):
    B, T, I = x.shape
    H = hidden_size
    E = 2 * H  # bidirectional
    U = min(unroll, T)
    assert T % U == 0, "T must be divisible by the unroll factor"

    # ------------- fused input projection for both directions -------------
    w_ih_cat = jnp.concatenate(
        [_reorder_gates(params["w_ih_fwd"]),
         _reorder_gates(params["w_ih_bwd"])], axis=0)            # (8H, I)
    b_cat = jnp.concatenate(
        [_reorder_gates(params["b_ih_fwd"] + params["b_hh_fwd"]),
         _reorder_gates(params["b_ih_bwd"] + params["b_hh_bwd"])])  # (8H,)
    x_flat = x.reshape(B * T, I).astype(jnp.float32)
    xproj = dense(x_flat, w_ih_cat, b_cat).reshape(B, T, 8 * H)

    # ------------------------------ BiLSTM ------------------------------
    w_hh_t = jnp.stack(
        [_reorder_gates(params["w_hh_fwd"]).T,
         _reorder_gates(params["w_hh_bwd"]).T], axis=0)          # (2, H, 4H)
    h_all, hn, cn = bilstm(xproj, w_hh_t, params["h0"], params["c0"], H, U)
    lstm_out2d = jnp.concatenate([h_all[0], h_all[1]],
                                 axis=-1).reshape(B * T, E)      # (B*T, 2H)

    # ------------- MultiheadAttention (num_heads=1) + LeakyReLU -------------
    out2d = attention_leakyrelu(
        lstm_out2d, binary_mask,
        params["in_proj_w"], params["in_proj_b"],
        params["out_proj_w"], params["out_proj_b"],
        batch=B, seq=T, num_heads=num_heads, neg_slope=0.1)

    # Dropout(0.2) is identity in eval mode.
    return out2d.reshape(B, T, E), (hn, cn)


# ----------------------------------------------------------------------------
# Deterministic parameter construction (shapes from the module's __init__).
# ----------------------------------------------------------------------------
def init_params(key, input_size, hidden_size, batch_size):
    H = hidden_size
    E = 2 * H
    ks = jax.random.split(key, 12)
    k_lstm = 1.0 / math.sqrt(H)

    def u(k, shape, bound):
        return jax.random.uniform(k, shape, jnp.float32, -bound, bound)

    return {
        "w_ih_fwd": u(ks[0], (4 * H, input_size), k_lstm),
        "w_hh_fwd": u(ks[1], (4 * H, H), k_lstm),
        "b_ih_fwd": u(ks[2], (4 * H,), k_lstm),
        "b_hh_fwd": u(ks[3], (4 * H,), k_lstm),
        "w_ih_bwd": u(ks[4], (4 * H, input_size), k_lstm),
        "w_hh_bwd": u(ks[5], (4 * H, H), k_lstm),
        "b_ih_bwd": u(ks[6], (4 * H,), k_lstm),
        "b_hh_bwd": u(ks[7], (4 * H,), k_lstm),
        "in_proj_w": u(ks[8], (3 * E, E), math.sqrt(6.0 / (E + E))),
        "in_proj_b": jnp.zeros((3 * E,), jnp.float32),
        "out_proj_w": u(ks[9], (E, E), 1.0 / math.sqrt(E)),
        "out_proj_b": jnp.zeros((E,), jnp.float32),
        # deterministic stand-in for the torch.randn initial states in forward()
        "h0": jax.random.normal(ks[10], (2, batch_size, H), jnp.float32),
        "c0": jax.random.normal(ks[11], (2, batch_size, H), jnp.float32),
    }


if __name__ == "__main__":
    B, T, INPUT, HIDDEN = 2, 8, 32, 32

    key = jax.random.PRNGKey(0)
    kx, kp = jax.random.split(key)

    x = jax.random.normal(kx, (B, T, INPUT), jnp.float32)
    lengths = jnp.array([8, 5], dtype=jnp.int32)
    binary_mask = (jnp.arange(T)[None, :] < lengths[:, None]).astype(jnp.float32)

    params = init_params(kp, INPUT, HIDDEN, B)

    fwd = jax.jit(functools.partial(global_information_extractor,
                                    hidden_size=HIDDEN, num_heads=1))
    out, (hn, cn) = fwd(x, binary_mask, params)
    jax.block_until_ready((out, hn, cn))

    assert out.shape == (B, T, 2 * HIDDEN)
    assert hn.shape == (2, B, HIDDEN)
    assert cn.shape == (2, B, HIDDEN)
    assert bool(jnp.all(jnp.isfinite(out)))
    assert bool(jnp.all(jnp.isfinite(hn))) and bool(jnp.all(jnp.isfinite(cn)))
    print("KERNEL_OK")
</pallas_src>

<mosaic_0001>
module attributes {stable_mosaic.version = 11 : i64} {
  func.func @_dense_kernel(%arg0: i32, %arg1: memref<16x32xf32, #tpu.memory_space<vmem>>, %arg2: memref<32x256xf32, #tpu.memory_space<vmem>>, %arg3: memref<1x256xf32, #tpu.memory_space<vmem>>, %arg4: memref<16x256xf32, #tpu.memory_space<vmem>>) attributes {dimension_semantics = [#tpu.dimension_semantics<parallel>], iteration_bounds = array<i64: 1>, scalar_prefetch = 0 : i64, scratch_operands = 0 : i64, tpu.core_type = #tpu.core_type<tc>, window_params = [{transform_indices = @transform_0, window_bounds = array<i64: 16, 32>}, {pipeline_mode = #tpu.pipeline_mode<synchronous>, transform_indices = @transform_1, window_bounds = array<i64: 32, 256>}, {pipeline_mode = #tpu.pipeline_mode<synchronous>, transform_indices = @transform_2, window_bounds = array<i64: 1, 256>}, {transform_indices = @transform_3, window_bounds = array<i64: 16, 256>}]} {
    %c0 = arith.constant 0 : index
    %c0_0 = arith.constant 0 : index
    %0 = vector.load %arg1[%c0, %c0_0] : memref<16x32xf32, #tpu.memory_space<vmem>>, vector<16x32xf32>
    %c0_1 = arith.constant 0 : index
    %c0_2 = arith.constant 0 : index
    %1 = vector.load %arg2[%c0_1, %c0_2] : memref<32x256xf32, #tpu.memory_space<vmem>>, vector<32x256xf32>
    %cst = arith.constant dense<0.000000e+00> : vector<16x256xf32>
    %2 = tpu.matmul %0, %1, %cst {dimension_numbers = #tpu.dot_dimension_numbers<[1], [0], [0], [1], [0, 0, 1, 1], [], []>} : vector<16x32xf32>, vector<32x256xf32>, vector<16x256xf32> -> vector<16x256xf32>
    %c0_3 = arith.constant 0 : index
    %c0_4 = arith.constant 0 : index
    %3 = vector.load %arg3[%c0_3, %c0_4] : memref<1x256xf32, #tpu.memory_space<vmem>>, vector<1x256xf32>
    %4 = vector.broadcast %3 : vector<1x256xf32> to vector<16x256xf32>
    %5 = arith.addf %2, %4 : vector<16x256xf32>
    %c0_5 = arith.constant 0 : index
    %c0_6 = arith.constant 0 : index
    %6 = vector.load %arg4[%c0_5, %c0_6] : memref<16x256xf32, #tpu.memory_space<vmem>>, vector<16x256xf32>
    tpu.vector_store %arg4[%c0_5, %c0_6], %5 {strides = array<i32>} : memref<16x256xf32, #tpu.memory_space<vmem>>, vector<16x256xf32>,
    return
  }
  func.func @transform_0(%arg0: i32) -> (i32, i32) {
    %c0_i32 = arith.constant 0 : i32
    %c0_i32_0 = arith.constant 0 : i32
    return %arg0, %c0_i32 : i32, i32
  }
  func.func @transform_1(%arg0: i32) -> (i32, i32) {
    %c0_i32 = arith.constant 0 : i32
    %c0_i32_0 = arith.constant 0 : i32
    %c0_i32_1 = arith.constant 0 : i32
    return %c0_i32, %c0_i32_0 : i32, i32
  }
  func.func @transform_2(%arg0: i32) -> (i32, i32) {
    %c0_i32 = arith.constant 0 : i32
    %c0_i32_0 = arith.constant 0 : i32
    %c0_i32_1 = arith.constant 0 : i32
    return %c0_i32, %c0_i32_0 : i32, i32
  }
  func.func @transform_3(%arg0: i32) -> (i32, i32) {
    %c0_i32 = arith.constant 0 : i32
    %c0_i32_0 = arith.constant 0 : i32
    return %arg0, %c0_i32 : i32, i32
  }
}

module attributes {stable_mosaic.version = 11 : i64} {
  func.func @_bilstm_kernel(%arg0: i32, %arg1: i32, %arg2: memref<2x8x128xf32, #tpu.memory_space<vmem>>, %arg3: memref<1x32x128xf32, #tpu.memory_space<vmem>>, %arg4: memref<1x2x32xf32, #tpu.memory_space<vmem>>, %arg5: memref<1x2x32xf32, #tpu.memory_space<vmem>>, %arg6: memref<1x2x8x32xf32, #tpu.memory_space<vmem>>, %arg7: memref<1x2x32xf32, #tpu.memory_space<vmem>>, %arg8: memref<1x2x32xf32, #tpu.memory_space<vmem>>, %arg9: memref<2x32xf32, #tpu.memory_space<vmem>>, %arg10: memref<2x32xf32, #tpu.memory_space<vmem>>) attributes {dimension_semantics = [#tpu.dimension_semantics<parallel>, #tpu.dimension_semantics<arbitrary>], iteration_bounds = array<i64: 2, 1>, scalar_prefetch = 0 : i64, scratch_operands = 2 : i64, tpu.core_type = #tpu.core_type<tc>, window_params = [{transform_indices = @transform_0, window_bounds = array<i64: 2, 8, 128>}, {transform_indices = @transform_1, window_bounds = array<i64: 1, 32, 128>}, {transform_indices = @transform_2, window_bounds = array<i64: 1, 2, 32>}, {transform_indices = @transform_3, window_bounds = array<i64: 1, 2, 32>}, {transform_indices = @transform_4, window_bounds = array<i64: 1, 2, 8, 32>}, {transform_indices = @transform_5, window_bounds = array<i64: 1, 2, 32>}, {transform_indices = @transform_6, window_bounds = array<i64: 1, 2, 32>}]} {
    %c0_i32 = arith.constant 0 : i32
    %0 = arith.cmpi eq, %arg0, %c0_i32 : i32
    %c0_i32_0 = arith.constant 0 : i32
    %1 = arith.cmpi eq, %arg1, %c0_i32_0 : i32
    %2 = arith.extui %1 : i1 to i32
    %c0_i32_1 = arith.constant 0 : i32
    %3 = arith.cmpi ne, %2, %c0_i32_1 : i32
    scf.if %3 {
      %c0_36 = arith.constant 0 : index
      %c0_37 = arith.constant 0 : index
      %c0_38 = arith.constant 0 : index
      %218 = vector.load %arg4[%c0_36, %c0_37, %c0_38] : memref<1x2x32xf32, #tpu.memory_space<vmem>>, vector<1x2x32xf32>
      %219 = vector.shape_cast %218 : vector<1x2x32xf32> to vector<2x32xf32>
      %c0_39 = arith.constant 0 : index
      %c0_40 = arith.constant 0 : index
      %220 = vector.load %arg9[%c0_39, %c0_40] : memref<2x32xf32, #tpu.memory_space<vmem>>, vector<2x32xf32>
      tpu.vector_store %arg9[%c0_39, %c0_40], %219 {strides = array<i32>} : memref<2x32xf32, #tpu.memory_space<vmem>>, vector<2x32xf32>,
      %c0_41 = arith.constant 0 : index
      %c0_42 = arith.constant 0 : index
      %c0_43 = arith.constant 0 : index
      %221 = vector.load %arg5[%c0_41, %c0_42, %c0_43] : memref<1x2x32xf32, #tpu.memory_space<vmem>>, vector<1x2x32xf32>
      %222 = vector.shape_cast %221 : vector<1x2x32xf32> to vector<2x32xf32>
      %c0_44 = arith.constant 0 : index
      %c0_45 = arith.constant 0 : index
      %223 = vector.load %arg10[%c0_44, %c0_45] : memref<2x32xf32, #tpu.memory_space<vmem>>, vector<2x32xf32>
      tpu.vector_store %arg10[%c0_44, %c0_45], %222 {strides = array<i32>} : memref<2x32xf32, #tpu.memory_space<vmem>>, vector<2x32xf32>,
    } else {
    }
    %c0 = arith.constant 0 : index
    %c0_2 = arith.constant 0 : index
    %c0_3 = arith.constant 0 : index
    %4 = vector.load %arg3[%c0, %c0_2, %c0_3] : memref<1x32x128xf32, #tpu.memory_space<vmem>>, vector<1x32x128xf32>
    %5 = vector.shape_cast %4 : vector<1x32x128xf32> to vector<32x128xf32>
    %c0_4 = arith.constant 0 : index
    %c0_5 = arith.constant 0 : index
    %c0_6 = arith.constant 0 : index
    %6 = vector.load %arg2[%c0_4, %c0_5, %c0_6] : memref<2x8x128xf32, #tpu.memory_space<vmem>>, vector<2x8x128xf32>
    %c0_7 = arith.constant 0 : index
    %c0_8 = arith.constant 0 : index
    %7 = vector.load %arg9[%c0_7, %c0_8] : memref<2x32xf32, #tpu.memory_space<vmem>>, vector<2x32xf32>
    %c0_9 = arith.constant 0 : index
    %c0_10 = arith.constant 0 : index
    %8 = vector.load %arg10[%c0_9, %c0_10] : memref<2x32xf32, #tpu.memory_space<vmem>>, vector<2x32xf32>
    %9 = vector.extract_strided_slice %6 {offsets = [0, 0, 0], sizes = [2, 1, 128], strides = [1, 1, 1]} : vector<2x8x128xf32> to vector<2x1x128xf32>
    %10 = vector.shape_cast %9 : vector<2x1x128xf32> to vector<2x128xf32>
    %11 = vector.extract_strided_slice %6 {offsets = [0, 7, 0], sizes = [2, 1, 128], strides = [1, 1, 1]} : vector<2x8x128xf32> to vector<2x1x128xf32>
    %12 = vector.shape_cast %11 : vector<2x1x128xf32> to vector<2x128xf32>
    %13 = arith.select %0, %10, %12 : vector<2x128xf32>
    %cst = arith.constant dense<0.000000e+00> : vector<2x128xf32>
    %14 = tpu.matmul %7, %5, %cst {dimension_numbers = #tpu.dot_dimension_numbers<[1], [0], [0], [1], [0, 0, 1, 1], [], []>} : vector<2x32xf32>, vector<32x128xf32>, vector<2x128xf32> -> vector<2x128xf32>
    %15 = arith.addf %13, %14 : vector<2x128xf32>
    %16 = vector.extract_strided_slice %15 {offsets = [0, 0], sizes = [2, 96], strides = [1, 1]} : vector<2x128xf32> to vector<2x96xf32>
    %17 = arith.negf %16 : vector<2x96xf32>
    %18 = math.exp %17 : vector<2x96xf32>
    %cst_11 = arith.constant 1.000000e+00 : f32
    %19 = vector.broadcast %cst_11 : f32 to vector<2x96xf32>
    %20 = arith.addf %19, %18 : vector<2x96xf32>
    %21 = arith.divf %19, %20 : vector<2x96xf32>
    %22 = vector.extract_strided_slice %15 {offsets = [0, 96], sizes = [2, 32], strides = [1, 1]} : vector<2x128xf32> to vector<2x32xf32>
    %23 = math.tanh %22 : vector<2x32xf32>
    %24 = vector.extract_strided_slice %21 {offsets = [0, 0], sizes = [2, 32], strides = [1, 1]} : vector<2x96xf32> to vector<2x32xf32>
    %25 = vector.extract_strided_slice %21 {offsets = [0, 32], sizes = [2, 32], strides = [1, 1]} : vector<2x96xf32> to vector<2x32xf32>
    %26 = vector.extract_strided_slice %21 {offsets = [0, 64], sizes = [2, 32], strides = [1, 1]} : vector<2x96xf32> to vector<2x32xf32>
    %27 = arith.mulf %25, %8 : vector<2x32xf32>
    %28 = arith.mulf %24, %23 : vector<2x32xf32>
    %29 = arith.addf %27, %28 : vector<2x32xf32>
    %30 = math.tanh %29 : vector<2x32xf32>
    %31 = arith.mulf %26, %30 : vector<2x32xf32>
    %32 = vector.extract_strided_slice %6 {offsets = [0, 1, 0], sizes = [2, 1, 128], strides = [1, 1, 1]} : vector<2x8x128xf32> to vector<2x1x128xf32>
    %33 = vector.shape_cast %32 : vector<2x1x128xf32> to vector<2x128xf32>
    %34 = vector.extract_strided_slice %6 {offsets = [0, 6, 0], sizes = [2, 1, 128], strides = [1, 1, 1]} : vector<2x8x128xf32> to vector<2x1x128xf32>
    %35 = vector.shape_cast %34 : vector<2x1x128xf32> to vector<2x128xf32>
    %36 = arith.select %0, %33, %35 : vector<2x128xf32>
    %cst_12 = arith.constant dense<0.000000e+00> : vector<2x128xf32>
    %37 = tpu.matmul %31, %5, %cst_12 {dimension_numbers = #tpu.dot_dimension_numbers<[1], [0], [0], [1], [0, 0, 1, 1], [], []>} : vector<2x32xf32>, vector<32x128xf32>, vector<2x128xf32> -> vector<2x128xf32>
    %38 = arith.addf %36, %37 : vector<2x128xf32>
    %39 = vector.extract_strided_slice %38 {offsets = [0, 0], sizes = [2, 96], strides = [1, 1]} : vector<2x128xf32> to vector<2x96xf32>
    %40 = arith.negf %39 : vector<2x96xf32>
    %41 = math.exp %40 : vector<2x96xf32>
    %cst_13 = arith.constant 1.000000e+00 : f32
    %42 = vector.broadcast %cst_13 : f32 to vector<2x96xf32>
    %43 = arith.addf %42, %41 : vector<2x96xf32>
    %44 = arith.divf %42, %43 : vector<2x96xf32>
    %45 = vector.extract_strided_slice %38 {offsets = [0, 96], sizes = [2, 32], strides = [1, 1]} : vector<2x128xf32> to vector<2x32xf32>
    %46 = math.tanh %45 : vector<2x32xf32>
    %47 = vector.extract_strided_slice %44 {offsets = [0, 0], sizes = [2, 32], strides = [1, 1]} : vector<2x96xf32> to vector<2x32xf32>
    %48 = vector.extract_strided_slice %44 {offsets = [0, 32], sizes = [2, 32], strides = [1, 1]} : vector<2x96xf32> to vector<2x32xf32>
    %49 = vector.extract_strided_slice %44 {offsets = [0, 64], sizes = [2, 32], strides = [1, 1]} : vector<2x96xf32> to vector<2x32xf32>
    %50 = arith.mulf %48, %29 : vector<2x32xf32>
    %51 = arith.mulf %47, %46 : vector<2x32xf32>
    %52 = arith.addf %50, %51 : vector<2x32xf32>
    %53 = math.tanh %52 : vector<2x32xf32>
    %54 = arith.mulf %49, %53 : vector<2x32xf32>
    %55 = vector.extract_strided_slice %6 {offsets = [0, 2, 0], sizes = [2, 1, 128], strides = [1, 1, 1]} : vector<2x8x128xf32> to vector<2x1x128xf32>
    %56 = vector.shape_cast %55 : vector<2x1x128xf32> to vector<2x128xf32>
    %57 = vector.extract_strided_slice %6 {offsets = [0, 5, 0], sizes = [2, 1, 128], strides = [1, 1, 1]} : vector<2x8x128xf32> to vector<2x1x128xf32>
    %58 = vector.shape_cast %57 : vector<2x1x128xf32> to vector<2x128xf32>
    %59 = arith.select %0, %56, %58 : vector<2x128xf32>
    %cst_14 = arith.constant dense<0.000000e+00> : vector<2x128xf32>
    %60 = tpu.matmul %54, %5, %cst_14 {dimension_numbers = #tpu.dot_dimension_numbers<[1], [0], [0], [1], [0, 0, 1, 1], [], []>} : vector<2x32xf32>, vector<32x128xf32>, vector<2x128xf32> -> vector<2x128xf32>
    %61 = arith.addf %59, %60 : vector<2x128xf32>
    %62 = vector.extract_strided_slice %61 {offsets = [0, 0], sizes = [2, 96], strides = [1, 1]} : vector<2x128xf32> to vector<2x96xf32>
    %63 = arith.negf %62 : vector<2x96xf32>
    %64 = math.exp %63 : vector<2x96xf32>
    %cst_15 = arith.constant 1.000000e+00 : f32
    %65 = vector.broadcast %cst_15 : f32 to vector<2x96xf32>
    %66 = arith.addf %65, %64 : vector<2x96xf32>
    %67 = arith.divf %65, %66 : vector<2x96xf32>
    %68 = vector.extract_strided_slice %61 {offsets = [0, 96], sizes = [2, 32], strides = [1, 1]} : vector<2x128xf32> to vector<2x32xf32>
    %69 = math.tanh %68 : vector<2x32xf32>
    %70 = vector.extract_strided_slice %67 {offsets = [0, 0], sizes = [2, 32], strides = [1, 1]} : vector<2x96xf32> to vector<2x32xf32>
    %71 = vector.extract_strided_slice %67 {offsets = [0, 32], sizes = [2, 32], strides = [1, 1]} : vector<2x96xf32> to vector<2x32xf32>
    %72 = vector.extract_strided_slice %67 {offsets = [0, 64], sizes = [2, 32], strides = [1, 1]} : vector<2x96xf32> to vector<2x32xf32>
    %73 = arith.mulf %71, %52 : vector<2x32xf32>
    %74 = arith.mulf %70, %69 : vector<2x32xf32>
    %75 = arith.addf %73, %74 : vector<2x32xf32>
    %76 = math.tanh %75 : vector<2x32xf32>
    %77 = arith.mulf %72, %76 : vector<2x32xf32>
    %78 = vector.extract_strided_slice %6 {offsets = [0, 3, 0], sizes = [2, 1, 128], strides = [1, 1, 1]} : vector<2x8x128xf32> to vector<2x1x128xf32>
    %79 = vector.shape_cast %78 : vector<2x1x128xf32> to vector<2x128xf32>
    %80 = vector.extract_strided_slice %6 {offsets = [0, 4, 0], sizes = [2, 1, 128], strides = [1, 1, 1]} : vector<2x8x128xf32> to vector<2x1x128xf32>
    %81 = vector.shape_cast %80 : vector<2x1x128xf32> to vector<2x128xf32>
    %82 = arith.select %0, %79, %81 : vector<2x128xf32>
    %cst_16 = arith.constant dense<0.000000e+00> : vector<2x128xf32>
    %83 = tpu.matmul %77, %5, %cst_16 {dimension_numbers = #tpu.dot_dimension_numbers<[1], [0], [0], [1], [0, 0, 1, 1], [], []>} : vector<2x32xf32>, vector<32x128xf32>, vector<2x128xf32> -> vector<2x128xf32>
    %84 = arith.addf %82, %83 : vector<2x128xf32>
    %85 = vector.extract_strided_slice %84 {offsets = [0, 0], sizes = [2, 96], strides = [1, 1]} : vector<2x128xf32> to vector<2x96xf32>
    %86 = arith.negf %85 : vector<2x96xf32>
    %87 = math.exp %86 : vector<2x96xf32>
    %cst_17 = arith.constant 1.000000e+00 : f32
    %88 = vector.broadcast %cst_17 : f32 to vector<2x96xf32>
    %89 = arith.addf %88, %87 : vector<2x96xf32>
    %90 = arith.divf %88, %89 : vector<2x96xf32>
    %91 = vector.extract_strided_slice %84 {offsets = [0, 96], sizes = [2, 32], strides = [1, 1]} : vector<2x128xf32> to vector<2x32xf32>
    %92 = math.tanh %91 : vector<2x32xf32>
    %93 = vector.extract_strided_slice %90 {offsets = [0, 0], sizes = [2, 32], strides = [1, 1]} : vector<2x96xf32> to vector<2x32xf32>
    %94 = vector.extract_strided_slice %90 {offsets = [0, 32], sizes = [2, 32], strides = [1, 1]} : vector<2x96xf32> to vector<2x32xf32>
    %95 = vector.extract_strided_slice %90 {offsets = [0, 64], sizes = [2, 32], strides = [1, 1]} : vector<2x96xf32> to vector<2x32xf32>
    %96 = arith.mulf %94, %75 : vector<2x32xf32>
    %97 = arith.mulf %93, %92 : vector<2x32xf32>
    %98 = arith.addf %96, %97 : vector<2x32xf32>
    %99 = math.tanh %98 : vector<2x32xf32>
    %100 = arith.mulf %95, %99 : vector<2x32xf32>
    %101 = vector.extract_strided_slice %6 {offsets = [0, 4, 0], sizes = [2, 1, 128], strides = [1, 1, 1]} : vector<2x8x128xf32> to vector<2x1x128xf32>
    %102 = vector.shape_cast %101 : vector<2x1x128xf32> to vector<2x128xf32>
    %103 = vector.extract_strided_slice %6 {offsets = [0, 3, 0], sizes = [2, 1, 128], strides = [1, 1, 1]} : vector<2x8x128xf32> to vector<2x1x128xf32>
    %104 = vector.shape_cast %103 : vector<2x1x128xf32> to vector<2x128xf32>
    %105 = arith.select %0, %102, %104 : vector<2x128xf32>
    %cst_18 = arith.constant dense<0.000000e+00> : vector<2x128xf32>
    %106 = tpu.matmul %100, %5, %cst_18 {dimension_numbers = #tpu.dot_dimension_numbers<[1], [0], [0], [1], [0, 0, 1, 1], [], []>} : vector<2x32xf32>, vector<32x128xf32>, vector<2x128xf32> -> vector<2x128xf32>
    %107 = arith.addf %105, %106 : vector<2x128xf32>
    %108 = vector.extract_strided_slice %107 {offsets = [0, 0], sizes = [2, 96], strides = [1, 1]} : vector<2x128xf32> to vector<2x96xf32>
    %109 = arith.negf %108 : vector<2x96xf32>
    %110 = math.exp %109 : vector<2x96xf32>
    %cst_19 = arith.constant 1.000000e+00 : f32
    %111 = vector.broadcast %cst_19 : f32 to vector<2x96xf32>
    %112 = arith.addf %111, %110 : vector<2x96xf32>
    %113 = arith.divf %111, %112 : vector<2x96xf32>
    %114 = vector.extract_strided_slice %107 {offsets = [0, 96], sizes = [2, 32], strides = [1, 1]} : vector<2x128xf32> to vector<2x32xf32>
    %115 = math.tanh %114 : vector<2x32xf32>
    %116 = vector.extract_strided_slice %113 {offsets = [0, 0], sizes = [2, 32], strides = [1, 1]} : vector<2x96xf32> to vector<2x32xf32>
    %117 = vector.extract_strided_slice %113 {offsets = [0, 32], sizes = [2, 32], strides = [1, 1]} : vector<2x96xf32> to vector<2x32xf32>
    %118 = vector.extract_strided_slice %113 {offsets = [0, 64], sizes = [2, 32], strides = [1, 1]} : vector<2x96xf32> to vector<2x32xf32>
    %119 = arith.mulf %117, %98 : vector<2x32xf32>
    %120 = arith.mulf %116, %115 : vector<2x32xf32>
    %121 = arith.addf %119, %120 : vector<2x32xf32>
    %122 = math.tanh %121 : vector<2x32xf32>
    %123 = arith.mulf %118, %122 : vector<2x32xf32>
    %124 = vector.extract_strided_slice %6 {offsets = [0, 5, 0], sizes = [2, 1, 128], strides = [1, 1, 1]} : vector<2x8x128xf32> to vector<2x1x128xf32>
    %125 = vector.shape_cast %124 : vector<2x1x128xf32> to vector<2x128xf32>
    %126 = vector.extract_strided_slice %6 {offsets = [0, 2, 0], sizes = [2, 1, 128], strides = [1, 1, 1]} : vector<2x8x128xf32> to vector<2x1x128xf32>
    %127 = vector.shape_cast %126 : vector<2x1x128xf32> to vector<2x128xf32>
    %128 = arith.select %0, %125, %127 : vector<2x128xf32>
    %cst_20 = arith.constant dense<0.000000e+00> : vector<2x128xf32>
    %129 = tpu.matmul %123, %5, %cst_20 {dimension_numbers = #tpu.dot_dimension_numbers<[1], [0], [0], [1], [0, 0, 1, 1], [], []>} : vector<2x32xf32>, vector<32x128xf32>, vector<2x128xf32> -> vector<2x128xf32>
    %130 = arith.addf %128, %129 : vector<2x128xf32>
    %131 = vector.extract_strided_slice %130 {offsets = [0, 0], sizes = [2, 96], strides = [1, 1]} : vector<2x128xf32> to vector<2x96xf32>
    %132 = arith.negf %131 : vector<2x96xf32>
    %133 = math.exp %132 : vector<2x96xf32>
    %cst_21 = arith.constant 1.000000e+00 : f32
    %134 = vector.broadcast %cst_21 : f32 to vector<2x96xf32>
    %135 = arith.addf %134, %133 : vector<2x96xf32>
    %136 = arith.divf %134, %135 : vector<2x96xf32>
    %137 = vector.extract_strided_slice %130 {offsets = [0, 96], sizes = [2, 32], strides = [1, 1]} : vector<2x128xf32> to vector<2x32xf32>
    %138 = math.tanh %137 : vector<2x32xf32>
    %139 = vector.extract_strided_slice %136 {offsets = [0, 0], sizes = [2, 32], strides = [1, 1]} : vector<2x96xf32> to vector<2x32xf32>
    %140 = vector.extract_strided_slice %136 {offsets = [0, 32], sizes = [2, 32], strides = [1, 1]} : vector<2x96xf32> to vector<2x32xf32>
    %141 = vector.extract_strided_slice %136 {offsets = [0, 64], sizes = [2, 32], strides = [1, 1]} : vector<2x96xf32> to vector<2x32xf32>
    %142 = arith.mulf %140, %121 : vector<2x32xf32>
    %143 = arith.mulf %139, %138 : vector<2x32xf32>
    %144 = arith.addf %142, %143 : vector<2x32xf32>
    %145 = math.tanh %144 : vector<2x32xf32>
    %146 = arith.mulf %141, %145 : vector<2x32xf32>
    %147 = vector.extract_strided_slice %6 {offsets = [0, 6, 0], sizes = [2, 1, 128], strides = [1, 1, 1]} : vector<2x8x128xf32> to vector<2x1x128xf32>
    %148 = vector.shape_cast %147 : vector<2x1x128xf32> to vector<2x128xf32>
    %149 = vector.extract_strided_slice %6 {offsets = [0, 1, 0], sizes = [2, 1, 128], strides = [1, 1, 1]} : vector<2x8x128xf32> to vector<2x1x128xf32>
    %150 = vector.shape_cast %149 : vector<2x1x128xf32> to vector<2x128xf32>
    %151 = arith.select %0, %148, %150 : vector<2x128xf32>
    %cst_22 = arith.constant dense<0.000000e+00> : vector<2x128xf32>
    %152 = tpu.matmul %146, %5, %cst_22 {dimension_numbers = #tpu.dot_dimension_numbers<[1], [0], [0], [1], [0, 0, 1, 1], [], []>} : vector<2x32xf32>, vector<32x128xf32>, vector<2x128xf32> -> vector<2x128xf32>
    %153 = arith.addf %151, %152 : vector<2x128xf32>
    %154 = vector.extract_strided_slice %153 {offsets = [0, 0], sizes = [2, 96], strides = [1, 1]} : vector<2x128xf32> to vector<2x96xf32>
    %155 = arith.negf %154 : vector<2x96xf32>
    %156 = math.exp %155 : vector<2x96xf32>
    %cst_23 = arith.constant 1.000000e+00 : f32
    %157 = vector.broadcast %cst_23 : f32 to vector<2x96xf32>
    %158 = arith.addf %157, %156 : vector<2x96xf32>
    %159 = arith.divf %157, %158 : vector<2x96xf32>
    %160 = vector.extract_strided_slice %153 {offsets = [0, 96], sizes = [2, 32], strides = [1, 1]} : vector<2x128xf32> to vector<2x32xf32>
    %161 = math.tanh %160 : vector<2x32xf32>
    %162 = vector.extract_strided_slice %159 {offsets = [0, 0], sizes = [2, 32], strides = [1, 1]} : vector<2x96xf32> to vector<2x32xf32>
    %163 = vector.extract_strided_slice %159 {offsets = [0, 32], sizes = [2, 32], strides = [1, 1]} : vector<2x96xf32> to vector<2x32xf32>
    %164 = vector.extract_strided_slice %159 {offsets = [0, 64], sizes = [2, 32], strides = [1, 1]} : vector<2x96xf32> to vector<2x32xf32>
    %165 = arith.mulf %163, %144 : vector<2x32xf32>
    %166 = arith.mulf %162, %161 : vector<2x32xf32>
    %167 = arith.addf %165, %166 : vector<2x32xf32>
    %168 = math.tanh %167 : vector<2x32xf32>
    %169 = arith.mulf %164, %168 : vector<2x32xf32>
    %170 = vector.extract_strided_slice %6 {offsets = [0, 7, 0], sizes = [2, 1, 128], strides = [1, 1, 1]} : vector<2x8x128xf32> to vector<2x1x128xf32>
    %171 = vector.shape_cast %170 : vector<2x1x128xf32> to vector<2x128xf32>
    %172 = vector.extract_strided_slice %6 {offsets = [0, 0, 0], sizes = [2, 1, 128], strides = [1, 1, 1]} : vector<2x8x128xf32> to vector<2x1x128xf32>
    %173 = vector.shape_cast %172 : vector<2x1x128xf32> to vector<2x128xf32>
    %174 = arith.select %0, %171, %173 : vector<2x128xf32>
    %cst_24 = arith.constant dense<0.000000e+00> : vector<2x128xf32>
    %175 = tpu.matmul %169, %5, %cst_24 {dimension_numbers = #tpu.dot_dimension_numbers<[1], [0], [0], [1], [0, 0, 1, 1], [], []>} : vector<2x32xf32>, vector<32x128xf32>, vector<2x128xf32> -> vector<2x128xf32>
    %176 = arith.addf %174, %175 : vector<2x128xf32>
    %177 = vector.extract_strided_slice %176 {offsets = [0, 0], sizes = [2, 96], strides = [1, 1]} : vector<2x128xf32> to vector<2x96xf32>
    %178 = arith.negf %177 : vector<2x96xf32>
    %179 = math.exp %178 : vector<2x96xf32>
    %cst_25 = arith.constant 1.000000e+00 : f32
    %180 = vector.broadcast %cst_25 : f32 to vector<2x96xf32>
    %181 = arith.addf %180, %179 : vector<2x96xf32>
    %182 = arith.divf %180, %181 : vector<2x96xf32>
    %183 = vector.extract_strided_slice %176 {offsets = [0, 96], sizes = [2, 32], strides = [1, 1]} : vector<2x128xf32> to vector<2x32xf32>
    %184 = math.tanh %183 : vector<2x32xf32>
    %185 = vector.extract_strided_slice %182 {offsets = [0, 0], sizes = [2, 32], strides = [1, 1]} : vector<2x96xf32> to vector<2x32xf32>
    %186 = vector.extract_strided_slice %182 {offsets = [0, 32], sizes = [2, 32], strides = [1, 1]} : vector<2x96xf32> to vector<2x32xf32>
    %187 = vector.extract_strided_slice %182 {offsets = [0, 64], sizes = [2, 32], strides = [1, 1]} : vector<2x96xf32> to vector<2x32xf32>
    %188 = arith.mulf %186, %167 : vector<2x32xf32>
    %189 = arith.mulf %185, %184 : vector<2x32xf32>
    %190 = arith.addf %188, %189 : vector<2x32xf32>
    %191 = math.tanh %190 : vector<2x32xf32>
    %192 = arith.mulf %187, %191 : vector<2x32xf32>
    %c0_26 = arith.constant 0 : index
    %c0_27 = arith.constant 0 : index
    %193 = vector.load %arg9[%c0_26, %c0_27] : memref<2x32xf32, #tpu.memory_space<vmem>>, vector<2x32xf32>
    tpu.vector_store %arg9[%c0_26, %c0_27], %192 {strides = array<i32>} : memref<2x32xf32, #tpu.memory_space<vmem>>, vector<2x32xf32>,
    %c0_28 = arith.constant 0 : index
    %c0_29 = arith.constant 0 : index
    %194 = vector.load %arg10[%c0_28, %c0_29] : memref<2x32xf32, #tpu.memory_space<vmem>>, vector<2x32xf32>
    tpu.vector_store %arg10[%c0_28, %c0_29], %190 {strides = array<i32>} : memref<2x32xf32, #tpu.memory_space<vmem>>, vector<2x32xf32>,
    %195 = arith.select %0, %31, %192 : vector<2x32xf32>
    %196 = arith.select %0, %54, %169 : vector<2x32xf32>
    %197 = arith.select %0, %77, %146 : vector<2x32xf32>
    %198 = arith.select %0, %100, %123 : vector<2x32xf32>
    %199 = arith.select %0, %123, %100 : vector<2x32xf32>
    %200 = arith.select %0, %146, %77 : vector<2x32xf32>
    %201 = arith.select %0, %169, %54 : vector<2x32xf32>
    %202 = arith.select %0, %192, %31 : vector<2x32xf32>
    %203 = vector.shape_cast %195 : vector<2x32xf32> to vector<2x1x32xf32>
    %204 = vector.shape_cast %196 : vector<2x32xf32> to vector<2x1x32xf32>
    %205 = vector.shape_cast %197 : vector<2x32xf32> to vector<2x1x32xf32>
    %206 = vector.shape_cast %198 : vector<2x32xf32> to vector<2x1x32xf32>
    %207 = vector.shape_cast %199 : vector<2x32xf32> to vector<2x1x32xf32>
    %208 = vector.shape_cast %200 : vector<2x32xf32> to vector<2x1x32xf32>
    %209 = vector.shape_cast %201 : vector<2x32xf32> to vector<2x1x32xf32>
    %210 = vector.shape_cast %202 : vector<2x32xf32> to vector<2x1x32xf32>
    %211 = tpu.concatenate %203, %204, %205, %206, %207, %208, %209, %210 in 1 : vector<2x1x32xf32>, vector<2x1x32xf32>, vector<2x1x32xf32>, vector<2x1x32xf32>, vector<2x1x32xf32>, vector<2x1x32xf32>, vector<2x1x32xf32>, vector<2x1x32xf32> -> vector<2x8x32xf32>
    %c0_30 = arith.constant 0 : index
    %c0_31 = arith.constant 0 : index
    %c0_32 = arith.constant 0 : index
    %c0_33 = arith.constant 0 : index
    %212 = vector.load %arg6[%c0_30, %c0_31, %c0_32, %c0_33] : memref<1x2x8x32xf32, #tpu.memory_space<vmem>>, vector<1x2x8x32xf32>
    %213 = vector.shape_cast %212 : vector<1x2x8x32xf32> to vector<2x8x32xf32>
    %214 = vector.shape_cast %211 : vector<2x8x32xf32> to vector<1x2x8x32xf32>
    tpu.vector_store %arg6[%c0_30, %c0_31, %c0_32, %c0_33], %214 {strides = array<i32>} : memref<1x2x8x32xf32, #tpu.memory_space<vmem>>, vector<1x2x8x32xf32>,
    %c0_i32_34 = arith.constant 0 : i32
    %215 = arith.cmpi eq, %arg1, %c0_i32_34 : i32
    %216 = arith.extui %215 : i1 to i32
    %c0_i32_35 = arith.constant 0 : i32
    %217 = arith.cmpi ne, %216, %c0_i32_35 : i32
    scf.if %217 {
      %c0_36 = arith.constant 0 : index
      %c0_37 = arith.constant 0 : index
      %c0_38 = arith.constant 0 : index
      %218 = vector.load %arg7[%c0_36, %c0_37, %c0_38] : memref<1x2x32xf32, #tpu.memory_space<vmem>>, vector<1x2x32xf32>
      %219 = vector.shape_cast %218 : vector<1x2x32xf32> to vector<2x32xf32>
      %220 = vector.shape_cast %192 : vector<2x32xf32> to vector<1x2x32xf32>
      tpu.vector_store %arg7[%c0_36, %c0_37, %c0_38], %220 {strides = array<i32>} : memref<1x2x32xf32, #tpu.memory_space<vmem>>, vector<1x2x32xf32>,
      %c0_39 = arith.constant 0 : index
      %c0_40 = arith.constant 0 : index
      %c0_41 = arith.constant 0 : index
      %221 = vector.load %arg8[%c0_39, %c0_40, %c0_41] : memref<1x2x32xf32, #tpu.memory_space<vmem>>, vector<1x2x32xf32>
      %222 = vector.shape_cast %221 : vector<1x2x32xf32> to vector<2x32xf32>
      %223 = vector.shape_cast %190 : vector<2x32xf32> to vector<1x2x32xf32>
      tpu.vector_store %arg8[%c0_39, %c0_40, %c0_41], %223 {strides = array<i32>} : memref<1x2x32xf32, #tpu.memory_space<vmem>>, vector<1x2x32xf32>,
    } else {
    }
    return
  }
  func.func @transform_0(%arg0: i32, %arg1: i32) -> (i32, i32, i32) {
    %c2_i32 = arith.constant 2 : i32
    %0 = arith.muli %c2_i32, %arg1 : i32
    %c0_i32 = arith.constant 0 : i32
    %1 = arith.subi %c0_i32, %0 : i32
    %2 = arith.muli %arg0, %1 : i32
    %3 = arith.addi %arg1, %2 : i32
    %c0_i32_0 = arith.constant 0 : i32
    %c0_i32_1 = arith.constant 0 : i32
    return %c0_i32_0, %3, %arg0 : i32, i32, i32
  }
  func.func @transform_1(%arg0: i32, %arg1: i32) -> (i32, i32, i32) {
    %c0_i32 = arith.constant 0 : i32
    %c0_i32_0 = arith.constant 0 : i32
    %c0_i32_1 = arith.constant 0 : i32
    return %arg0, %c0_i32, %c0_i32_0 : i32, i32, i32
  }
  func.func @transform_2(%arg0: i32, %arg1: i32) -> (i32, i32, i32) {
    %c0_i32 = arith.constant 0 : i32
    %c0_i32_0 = arith.constant 0 : i32
    %c0_i32_1 = arith.constant 0 : i32
    return %arg0, %c0_i32, %c0_i32_0 : i32, i32, i32
  }
  func.func @transform_3(%arg0: i32, %arg1: i32) -> (i32, i32, i32) {
    %c0_i32 = arith.constant 0 : i32
    %c0_i32_0 = arith.constant 0 : i32
    %c0_i32_1 = arith.constant 0 : i32
    return %arg0, %c0_i32, %c0_i32_0 : i32, i32, i32
  }
  func.func @transform_4(%arg0: i32, %arg1: i32) -> (i32, i32, i32, i32) {
    %c2_i32 = arith.constant 2 : i32
    %0 = arith.muli %c2_i32, %arg1 : i32
    %c0_i32 = arith.constant 0 : i32
    %1 = arith.subi %c0_i32, %0 : i32
    %2 = arith.muli %arg0, %1 : i32
    %3 = arith.addi %arg1, %2 : i32
    %c0_i32_0 = arith.constant 0 : i32
    %c0_i32_1 = arith.constant 0 : i32
    %c0_i32_2 = arith.constant 0 : i32
    return %arg0, %c0_i32_0, %3, %c0_i32_1 : i32, i32, i32, i32
  }
  func.func @transform_5(%arg0: i32, %arg1: i32) -> (i32, i32, i32) {
    %c0_i32 = arith.constant 0 : i32
    %c0_i32_0 = arith.constant 0 : i32
    %c0_i32_1 = arith.constant 0 : i32
    return %arg0, %c0_i32, %c0_i32_0 : i32, i32, i32
  }
  func.func @transform_6(%arg0: i32, %arg1: i32) -> (i32, i32, i32) {
    %c0_i32 = arith.constant 0 : i32
    %c0_i32_0 = arith.constant 0 : i32
    %c0_i32_1 = arith.constant 0 : i32
    return %arg0, %c0_i32, %c0_i32_0 : i32, i32, i32
  }
}

module attributes {stable_mosaic.version = 11 : i64} {
  func.func @_attn_kernel(%arg0: memref<16x64xf32, #tpu.memory_space<vmem>>, %arg1: memref<64x192xf32, #tpu.memory_space<vmem>>, %arg2: memref<1x192xf32, #tpu.memory_space<vmem>>, %arg3: memref<64x64xf32, #tpu.memory_space<vmem>>, %arg4: memref<1x64xf32, #tpu.memory_space<vmem>>, %arg5: memref<2x8xf32, #tpu.memory_space<vmem>>, %arg6: memref<16x1xf32, #tpu.memory_space<vmem>>, %arg7: memref<16x64xf32, #tpu.memory_space<vmem>>) attributes {dimension_semantics = [], scalar_prefetch = 0 : i64, scratch_operands = 0 : i64, tpu.core_type = #tpu.core_type<tc>} {
    %c0 = arith.constant 0 : index
    %c0_0 = arith.constant 0 : index
    %0 = vector.load %arg0[%c0, %c0_0] : memref<16x64xf32, #tpu.memory_space<vmem>>, vector<16x64xf32>
    %c0_1 = arith.constant 0 : index
    %c0_2 = arith.constant 0 : index
    %1 = vector.load %arg1[%c0_1, %c0_2] : memref<64x192xf32, #tpu.memory_space<vmem>>, vector<64x192xf32>
    %cst = arith.constant dense<0.000000e+00> : vector<16x192xf32>
    %2 = tpu.matmul %0, %1, %cst {dimension_numbers = #tpu.dot_dimension_numbers<[1], [0], [0], [1], [0, 0, 1, 1], [], []>} : vector<16x64xf32>, vector<64x192xf32>, vector<16x192xf32> -> vector<16x192xf32>
    %c0_3 = arith.constant 0 : index
    %c0_4 = arith.constant 0 : index
    %3 = vector.load %arg2[%c0_3, %c0_4] : memref<1x192xf32, #tpu.memory_space<vmem>>, vector<1x192xf32>
    %4 = vector.broadcast %3 : vector<1x192xf32> to vector<16x192xf32>
    %5 = arith.addf %2, %4 : vector<16x192xf32>
    %6 = vector.extract_strided_slice %5 {offsets = [0, 0], sizes = [16, 64], strides = [1, 1]} : vector<16x192xf32> to vector<16x64xf32>
    %cst_5 = arith.constant 1.250000e-01 : f32
    %7 = vector.broadcast %cst_5 : f32 to vector<16x64xf32>
    %8 = arith.mulf %6, %7 : vector<16x64xf32>
    %9 = vector.extract_strided_slice %5 {offsets = [0, 64], sizes = [16, 64], strides = [1, 1]} : vector<16x192xf32> to vector<16x64xf32>
    %10 = vector.extract_strided_slice %5 {offsets = [0, 128], sizes = [16, 64], strides = [1, 1]} : vector<16x192xf32> to vector<16x64xf32>
    %11 = tpu.iota {dimensions = array<i32: 0>} : vector<8x8xi32>
    %12 = tpu.iota {dimensions = array<i32: 1>} : vector<8x8xi32>
    %13 = arith.cmpi eq, %11, %12 : vector<8x8xi32>
    %14 = vector.extract_strided_slice %8 {offsets = [0, 0], sizes = [8, 64], strides = [1, 1]} : vector<16x64xf32> to vector<8x64xf32>
    %15 = vector.extract_strided_slice %9 {offsets = [0, 0], sizes = [8, 64], strides = [1, 1]} : vector<16x64xf32> to vector<8x64xf32>
    %16 = vector.extract_strided_slice %10 {offsets = [0, 0], sizes = [8, 64], strides = [1, 1]} : vector<16x64xf32> to vector<8x64xf32>
    %c0_6 = arith.constant 0 : index
    %c0_7 = arith.constant 0 : index
    %17 = vector.load %arg6[%c0_6, %c0_7] : memref<16x1xf32, #tpu.memory_space<vmem>>, vector<8x1xf32>
    %cst_8 = arith.constant 0.000000e+00 : f32
    %18 = vector.broadcast %cst_8 : f32 to vector<8x1xf32>
    %19 = arith.cmpf one, %17, %18 : vector<8x1xf32>
    %c0_9 = arith.constant 0 : index
    %c0_10 = arith.constant 0 : index
    %20 = vector.load %arg5[%c0_9, %c0_10] : memref<2x8xf32, #tpu.memory_space<vmem>>, vector<1x8xf32>
    %cst_11 = arith.constant 0.000000e+00 : f32
    %21 = vector.broadcast %cst_11 : f32 to vector<1x8xf32>
    %22 = arith.cmpf one, %20, %21 : vector<1x8xf32>
    %23 = vector.broadcast %19 : vector<8x1xi1> to vector<8x8xi1>
    %24 = vector.broadcast %22 : vector<1x8xi1> to vector<8x8xi1>
    %25 = arith.andi %23, %24 : vector<8x8xi1>
    %26 = arith.ori %25, %13 : vector<8x8xi1>
    %27 = tpu.transpose %15, [1, 0] : vector<8x64xf32> -> vector<64x8xf32>
    %cst_12 = arith.constant dense<0.000000e+00> : vector<8x8xf32>
    %28 = tpu.matmul %14, %27, %cst_12 {dimension_numbers = #tpu.dot_dimension_numbers<[1], [0], [0], [1], [0, 0, 1, 1], [], []>} : vector<8x64xf32>, vector<64x8xf32>, vector<8x8xf32> -> vector<8x8xf32>
    %cst_13 = arith.constant -1.000000e+30 : f32
    %29 = vector.broadcast %cst_13 : f32 to vector<8x8xf32>
    %30 = arith.select %26, %28, %29 : vector<8x8xi1>, vector<8x8xf32>
    %cst_14 = arith.constant dense<0xFF800000> : vector<8xf32>
    %31 = vector.multi_reduction <maximumf>, %30, %cst_14 [1] : vector<8x8xf32> to vector<8xf32>
    %32 = vector.shape_cast %31 : vector<8xf32> to vector<8x1xf32>
    %33 = vector.broadcast %32 : vector<8x1xf32> to vector<8x8xf32>
    %34 = arith.subf %30, %33 : vector<8x8xf32>
    %35 = math.exp %34 : vector<8x8xf32>
    %cst_15 = arith.constant dense<0.000000e+00> : vector<8xf32>
    %36 = vector.multi_reduction <add>, %35, %cst_15 [1] : vector<8x8xf32> to vector<8xf32>
    %37 = vector.shape_cast %36 : vector<8xf32> to vector<8x1xf32>
    %cst_16 = arith.constant dense<0.000000e+00> : vector<8x64xf32>
    %38 = tpu.matmul %35, %16, %cst_16 {dimension_numbers = #tpu.dot_dimension_numbers<[1], [0], [0], [1], [0, 0, 1, 1], [], []>} : vector<8x8xf32>, vector<8x64xf32>, vector<8x64xf32> -> vector<8x64xf32>
    %39 = tpu.reciprocal %37 {approx = true} : vector<8x1xf32> -> vector<8x1xf32>
    %40 = vector.broadcast %39 : vector<8x1xf32> to vector<8x64xf32>
    %41 = arith.mulf %38, %40 : vector<8x64xf32>
    %42 = vector.extract_strided_slice %8 {offsets = [8, 0], sizes = [8, 64], strides = [1, 1]} : vector<16x64xf32> to vector<8x64xf32>
    %43 = vector.extract_strided_slice %9 {offsets = [8, 0], sizes = [8, 64], strides = [1, 1]} : vector<16x64xf32> to vector<8x64xf32>
    %44 = vector.extract_strided_slice %10 {offsets = [8, 0], sizes = [8, 64], strides = [1, 1]} : vector<16x64xf32> to vector<8x64xf32>
    %c8 = arith.constant 8 : index
    %c0_17 = arith.constant 0 : index
    %45 = vector.load %arg6[%c8, %c0_17] : memref<16x1xf32, #tpu.memory_space<vmem>>, vector<8x1xf32>
    %cst_18 = arith.constant 0.000000e+00 : f32
    %46 = vector.broadcast %cst_18 : f32 to vector<8x1xf32>
    %47 = arith.cmpf one, %45, %46 : vector<8x1xf32>
    %c1 = arith.constant 1 : index
    %c0_19 = arith.constant 0 : index
    %48 = vector.load %arg5[%c1, %c0_19] : memref<2x8xf32, #tpu.memory_space<vmem>>, vector<1x8xf32>
    %cst_20 = arith.constant 0.000000e+00 : f32
    %49 = vector.broadcast %cst_20 : f32 to vector<1x8xf32>
    %50 = arith.cmpf one, %48, %49 : vector<1x8xf32>
    %51 = vector.broadcast %47 : vector<8x1xi1> to vector<8x8xi1>
    %52 = vector.broadcast %50 : vector<1x8xi1> to vector<8x8xi1>
    %53 = arith.andi %51, %52 : vector<8x8xi1>
    %54 = arith.ori %53, %13 : vector<8x8xi1>
    %55 = tpu.transpose %43, [1, 0] : vector<8x64xf32> -> vector<64x8xf32>
    %cst_21 = arith.constant dense<0.000000e+00> : vector<8x8xf32>
    %56 = tpu.matmul %42, %55, %cst_21 {dimension_numbers = #tpu.dot_dimension_numbers<[1], [0], [0], [1], [0, 0, 1, 1], [], []>} : vector<8x64xf32>, vector<64x8xf32>, vector<8x8xf32> -> vector<8x8xf32>
    %cst_22 = arith.constant -1.000000e+30 : f32
    %57 = vector.broadcast %cst_22 : f32 to vector<8x8xf32>
    %58 = arith.select %54, %56, %57 : vector<8x8xi1>, vector<8x8xf32>
    %cst_23 = arith.constant dense<0xFF800000> : vector<8xf32>
    %59 = vector.multi_reduction <maximumf>, %58, %cst_23 [1] : vector<8x8xf32> to vector<8xf32>
    %60 = vector.shape_cast %59 : vector<8xf32> to vector<8x1xf32>
    %61 = vector.broadcast %60 : vector<8x1xf32> to vector<8x8xf32>
    %62 = arith.subf %58, %61 : vector<8x8xf32>
    %63 = math.exp %62 : vector<8x8xf32>
    %cst_24 = arith.constant dense<0.000000e+00> : vector<8xf32>
    %64 = vector.multi_reduction <add>, %63, %cst_24 [1] : vector<8x8xf32> to vector<8xf32>
    %65 = vector.shape_cast %64 : vector<8xf32> to vector<8x1xf32>
    %cst_25 = arith.constant dense<0.000000e+00> : vector<8x64xf32>
    %66 = tpu.matmul %63, %44, %cst_25 {dimension_numbers = #tpu.dot_dimension_numbers<[1], [0], [0], [1], [0, 0, 1, 1], [], []>} : vector<8x8xf32>, vector<8x64xf32>, vector<8x64xf32> -> vector<8x64xf32>
    %67 = tpu.reciprocal %65 {approx = true} : vector<8x1xf32> -> vector<8x1xf32>
    %68 = vector.broadcast %67 : vector<8x1xf32> to vector<8x64xf32>
    %69 = arith.mulf %66, %68 : vector<8x64xf32>
    %70 = tpu.concatenate %41, %69 in 0 : vector<8x64xf32>, vector<8x64xf32> -> vector<16x64xf32>
    %c0_26 = arith.constant 0 : index
    %c0_27 = arith.constant 0 : index
    %71 = vector.load %arg3[%c0_26, %c0_27] : memref<64x64xf32, #tpu.memory_space<vmem>>, vector<64x64xf32>
    %cst_28 = arith.constant dense<0.000000e+00> : vector<16x64xf32>
    %72 = tpu.matmul %70, %71, %cst_28 {dimension_numbers = #tpu.dot_dimension_numbers<[1], [0], [0], [1], [0, 0, 1, 1], [], []>} : vector<16x64xf32>, vector<64x64xf32>, vector<16x64xf32> -> vector<16x64xf32>
    %c0_29 = arith.constant 0 : index
    %c0_30 = arith.constant 0 : index
    %73 = vector.load %arg4[%c0_29, %c0_30] : memref<1x64xf32, #tpu.memory_space<vmem>>, vector<1x64xf32>
    %74 = vector.broadcast %73 : vector<1x64xf32> to vector<16x64xf32>
    %75 = arith.addf %72, %74 : vector<16x64xf32>
    %cst_31 = arith.constant 0.000000e+00 : f32
    %76 = vector.broadcast %cst_31 : f32 to vector<16x64xf32>
    %77 = arith.cmpf ogt, %75, %76 : vector<16x64xf32>
    %cst_32 = arith.constant 1.000000e-01 : f32
    %78 = vector.broadcast %cst_32 : f32 to vector<16x64xf32>
    %79 = arith.mulf %78, %75 : vector<16x64xf32>
    %80 = arith.select %77, %75, %79 : vector<16x64xi1>, vector<16x64xf32>
    %c0_33 = arith.constant 0 : index
    %c0_34 = arith.constant 0 : index
    %81 = vector.load %arg7[%c0_33, %c0_34] : memref<16x64xf32, #tpu.memory_space<vmem>>, vector<16x64xf32>
    tpu.vector_store %arg7[%c0_33, %c0_34], %80 {strides = array<i32>} : memref<16x64xf32, #tpu.memory_space<vmem>>, vector<16x64xf32>,
    return
  }
}

</mosaic_0001>

<bundles_post_ra>
// kernel: global_information_extractor.3
= control target key start
LH: loop header
LB: loop body
LE: loop exit
PB: predicated region body
PF: predicated region fallthrough
CT: control target
= control target key end

     0   :  { %vm30_vm0 = vcmask 261120   ;;  %s168_s1 = inlined_call_operand.vmem [shape: f32[32,256], index: 1, kind: input, shape index: {}]   ;;  %s169_s0 = inlined_call_operand.vmem [shape: f32[16,32], index: 0, kind: input, shape index: {}]   ;;  %s170_s2 = inlined_call_operand.vmem [shape: f32[1,256], index: 2, kind: input, shape index: {}]   ;;  %s171_s3 = inlined_call_operand.vmem [shape: f32[16,256], index: 3, kind: output, shape index: {}]  }
   0x1   :  { %v22_v0 = vld [vmem:[%s168_s1 + $0x30] sm:$0xff]  ;;  %v23_v1 = vld [vmem:[%s168_s1 + $0x38] sm:$0xff]  ;;  %v20_v2 = vld [vmem:[%s168_s1 + $0x20] sm:$0xff] }
   0x2   :  { %95 = vmatpush.msra.mxu2 %v22_v0  ;;  %99 = vmatpush.msra.mxu3 %v23_v1  ;;  %v21_v3 = vld [vmem:[%s168_s1 + $0x28] sm:$0xff]  ;;  %v18_v4 = vld [vmem:[%s168_s1 + $0x10] sm:$0xff]  ;;  %v19_v5 = vld [vmem:[%s168_s1 + $0x18] sm:$0xff] }
   0x3   :  { %49 = vmatpush.msra.mxu0 %v22_v0  ;;  %72 = vmatpush.msra.mxu1 %v23_v1  ;;  %v16_v6 = vld [vmem:[%s168_s1] sm:$0xff]  ;;  %v17_v7 = vld [vmem:[%s168_s1 + $0x8] sm:$0xff] }
   0x4   :  { %96 = vmatpush.msra.mxu2 %v20_v2  ;;  %100 = vmatpush.msra.mxu3 %v21_v3  ;;  %v15_v8 = vld [vmem:[%s169_s0 + $0x8] sm:$0xff]  ;;  %v14_v9 = vld [vmem:[%s169_s0] sm:$0xff] }
   0x5   :  { %50 = vmatpush.msra.mxu0 %v20_v2  ;;  %73 = vmatpush.msra.mxu1 %v21_v3  ;;  %v24_v10 = vld [vmem:[%s170_s2] sm:$0x3] }
   0x6   :  { %97 = vmatpush.msra.mxu2 %v18_v4  ;;  %101 = vmatpush.msra.mxu3 %v19_v5  ;;  %v26_v11 = vperm.slane %v24_v10, 0  ;;  %v27_v12 = vperm.slane %v24_v10, 1 }
   0x7   :  { %51 = vmatpush.msra.mxu0 %v18_v4  ;;  %74 = vmatpush.msra.mxu1 %v19_v5 }
   0x8   :  { %98 = vmatpush.msra.mxu2 %v16_v6  ;;  %102 = vmatpush.msra.mxu3 %v17_v7 }
   0x9   :  { %92 = vmatmul.msk.f32.vlgmr.msra.gmra.mxu2 %vm30_vm0, %v15_v8  ;;  %94 = vmatmul.msk.f32.vlgmr.msra.gmra.mxu3 %vm30_vm0, %v15_v8 }
   0xa   :  { %52 = vmatpush.msra.mxu0 %v16_v6  ;;  %75 = vmatpush.msra.mxu1 %v17_v7 }
   0xb   :  { %91 = vmatmul.msk.f32.vlgmr.msra.gmra.mxu0 %vm30_vm0, %v14_v9  ;;  %93 = vmatmul.msk.f32.vlgmr.msra.gmra.mxu1 %vm30_vm0, %v14_v9 }
  0x88   :  { %v54_v13 = vpop.f32.mrf.mxu0  ;;  %v77_v14 = vpop.f32.mrf.mxu1 }
  0x89   :  { %v55_v15 = vadd.f32 %v54_v13, %v26_v11  ;;  %v78_v16 = vadd.f32 %v77_v14, %v27_v12 }
  0x8b   :  { %83 = vst [vmem:[%s171_s3] sm:$0xff] %v55_v15 }
  0x8c   :  { %v57_v17 = vpop.f32.mrf.mxu2  ;;  %84 = vst [vmem:[%s171_s3 + $0x8] sm:$0xff] %v78_v16  ;;  %v80_v18 = vpop.f32.mrf.mxu3 }
  0x8d   :  { %v58_v19 = vadd.f32 %v57_v17, %v26_v11  ;;  %v81_v20 = vadd.f32 %v80_v18, %v27_v12 }
  0x8f   :  { %85 = vst [vmem:[%s171_s3 + $0x10] sm:$0xff] %v58_v19 }
  0x90   :  { %86 = vst [vmem:[%s171_s3 + $0x18] sm:$0xff] %v81_v20 }

// kernel: global_information_extractor.5
= control target key start
LH: loop header
LB: loop body
LE: loop exit
PB: predicated region body
PF: predicated region fallthrough
CT: control target
= control target key end

     0   :  { %s553_s0 = inlined_call_operand.vmem [shape: f32[16,64], index: 0, kind: input, shape index: {}]   ;;  %s554_s1 = inlined_call_operand.vmem [shape: f32[64,192], index: 1, kind: input, shape index: {}]   ;;  %s555_s2 = inlined_call_operand.vmem [shape: f32[1,192], index: 2, kind: input, shape index: {}]   ;;  %s556_s3 = inlined_call_operand.vmem [shape: f32[64,64], index: 3, kind: input, shape index: {}]   ;;  %s557_s4 = inlined_call_operand.vmem [shape: f32[1,64], index: 4, kind: input, shape index: {}]   ;;  %s558_s5 = inlined_call_operand.vmem [shape: f32[2,8], index: 5, kind: input, shape index: {}]   ;;  %s559_s6 = inlined_call_operand.vmem [shape: f32[16,1], index: 6, kind: input, shape index: {}]   ;;  %s560_s7 = inlined_call_operand.hbm [shape: f32[16,64], index: 7, kind: output, shape index: {}]  }
   0x1   :  { %v43_v0 = vld [vmem:[%s554_s1 + $0x70] sm:$0xff]  ;;  %v41_v1 = vld [vmem:[%s554_s1 + $0x60] sm:$0xff] }
   0x2   :  { %66 = vmatpush.msra.mxu0 %v43_v0  ;;  %v39_v2 = vld [vmem:[%s554_s1 + $0x50] sm:$0xff]  ;;  %v37_v3 = vld [vmem:[%s554_s1 + $0x40] sm:$0xff] }
   0x4   :  { %67 = vmatpush.msra.mxu0 %v41_v1 }
   0x5   :  { %12 = vsyncpa [#allocation3], 0  ;;  %v35_v4 = vld [vmem:[%s554_s1 + $0x30] sm:$0xff]  ;;  %v33_v5 = vld [vmem:[%s554_s1 + $0x20] sm:$0xff]  ;;  %vm51_vm0 = vcmask 523264   ;;  %s387_s23 = smov 64   ;;  %v106_v35 = vlaneseq }
   0x6   :  { %68 = vmatpush.msra.mxu0 %v39_v2  ;;  %v31_v6 = vld [vmem:[%s554_s1 + $0x10] sm:$0xff]  ;;  %v29_v7 = vld [vmem:[%s554_s1] sm:$0xff]  ;;  %v28_v9 = vld [vmem:[%s553_s0 + $0x8] sm:$0xff]  ;;  %v388_v17 = vmov 0   ;;  %vm154_vm10 = vcmask 64512   ;;  %s321_s15 = sshll.u32 %s560_s7, 4  ;;  %s322_s15 = int_to_ptr.hbm [resolvable:$true] %s321_s15 }
   0x7   :  { %v27_v8 = vld [vmem:[%s553_s0] sm:$0xff]  ;;  %350 = vset.pattern.permute.xlu1 %v388_v17  ;;  %351 = vset.pattern.permute.xlu0 %v388_v17  ;;  %v189_v19 = vld [vmem:[%s559_s6 + $0x8] sm:$0xff]  ;;  %v44_v20 = vld [vmem:[%s554_s1 + $0x78] sm:$0xff]  ;;  %v107_v39 = vshrl.u32 %v106_v35, 7  ;;  %v109_v40 = vand.u32 127, %v106_v35  ;;  %s391_s16 = smov 8  }
   0x8   :  { %69 = vmatpush.msra.mxu0 %v37_v3  ;;  %v467_v10 = vld [vmem:[%s555_s2] sm:$0x3]  ;;  %v42_v21 = vld [vmem:[%s554_s1 + $0x68] sm:$0xff]  ;;  %vm190_vm2 = vcmp.ne.f32.partialorder %v189_v19, 0.0  ;;  %89 = vmatpush.msra.mxu1 %v44_v20  ;;  %v40_v22 = vld [vmem:[%s554_s1 + $0x58] sm:$0xff] }
   0x9   :  { %v47_v11 = vperm.slane %v467_v10, 0  ;;  %v111_v16 = vld [vmem:[%s559_s6] sm:$0xff]  ;;  %v193_v23 = vsel %vm190_vm2, 1, %v388_v17  ;;  %v38_v24 = vld [vmem:[%s554_s1 + $0x48] sm:$0xff]  ;;  %v36_v25 = vld [vmem:[%s554_s1 + $0x38] sm:$0xff]  ;;  %vm110_vm8 = vcmp.eq.s32.totalorder %v107_v39, %v109_v40  ;;  %v48_v51 = vperm.slane %v467_v10, 1 }
   0xa   :  { %70 = vmatpush.msra.mxu0 %v35_v4  ;;  %vm112_vm1 = vcmp.ne.f32.partialorder %v111_v16, 0.0  ;;  %90 = vmatpush.msra.mxu1 %v42_v21  ;;  %v34_v30 = vld [vmem:[%s554_s1 + $0x28] sm:$0xff]  ;;  %v32_v31 = vld [vmem:[%s554_s1 + $0x18] sm:$0xff]  ;;  %v113_v33 = vld [vmem:[%s558_s5] sm:$0x1] }
   0xb   :  { %v115_v18 = vsel %vm112_vm1, 1, %v388_v17  ;;  %v30_v32 = vld [vmem:[%s554_s1 + $0x8] sm:$0xff]  ;;  %vm114_vm3 = vcmp.ne.f32.partialorder %v113_v33, 0.0  ;;  %v191_v38 = vld [vmem:[%s558_s5 + $0x1] sm:$0x1]  ;;  %v273_v1 = vld [vmem:[%s556_s3 + $0x38] sm:$0xff] }
   0xc   :  { %71 = vmatpush.msra.mxu0 %v33_v5  ;;  %117 = vperm.xlu1 %350, %v115_v18   ;;  %v120_v34 = vsel %vm114_vm3, 1, %v388_v17  ;;  %vm192_vm6 = vcmp.ne.f32.partialorder %v191_v38, 0.0  ;;  %v272_v2 = vld [vmem:[%s556_s3 + $0x30] sm:$0xff]  ;;  %v271_v3 = vld [vmem:[%s556_s3 + $0x28] sm:$0xff]  ;;  %v270_v4 = vld [vmem:[%s556_s3 + $0x20] sm:$0xff] }
   0xd   :  { %91 = vmatpush.msra.mxu1 %v40_v22  ;;  %v121_v36 = vperm.slane %v120_v34, 0  ;;  %v198_v41 = vsel %vm192_vm6, 1, %v388_v17  ;;  %v269_v5 = vld [vmem:[%s556_s3 + $0x18] sm:$0xff]  ;;  %v352_v17 = vld [vmem:[%s557_s4] ss:$0 sm:$0xff]  ;;  %s390_s4 = smov 128  }
   0xe   :  { %72 = vmatpush.msra.mxu0 %v31_v6  ;;  %v199_v42 = vperm.slane %v198_v41, 0  ;;  %v268_v6 = vld [vmem:[%s556_s3 + $0x10] sm:$0xff] }
   0xf   :  { %92 = vmatpush.msra.mxu1 %v38_v24  ;;  %vm122_vm4 = vcmp.eq.s32.totalorder %v121_v36, 1 }
  0x10   :  { %73 = vmatpush.msra.mxu0 %v29_v7  ;;  %vm200_vm11 = vcmp.eq.s32.totalorder %v199_v42, 1  ;;  %v267_v7 = vld [vmem:[%s556_s3 + $0x8] sm:$0xff] }
  0x11   :  { %333 = vmatmul.msk.f32.vlgmr.msra.gmra.mxu0 %vm51_vm0, %v27_v8  ;;  %93 = vmatpush.msra.mxu1 %v36_v25 }
  0x13   :  { %94 = vmatpush.msra.mxu1 %v34_v30 }
  0x14   :  { %195 = vperm.xlu1 %350, %v193_v23  }
  0x15   :  { %95 = vmatpush.msra.mxu1 %v32_v31 }
  0x17   :  { %96 = vmatpush.msra.mxu1 %v30_v32 }
  0x18   :  { %335 = vmatmul.msk.f32.vlgmr.msra.gmra.mxu1 %vm51_vm0, %v27_v8  ;;  %v266_v8 = vld [vmem:[%s556_s3] sm:$0xff]  ;;  %s389_s3 = smov [#allocation2]  }
  0x19   :  { %334 = vmatmul.msk.f32.gmra.mxu0 %vm51_vm0, %v28_v9  ;;  %s319_s12 = sshll.u32 %s389_s3, 4  ;;  %s320_s12 = int_to_ptr.vmem [resolvable:$true] %s319_s12 }
  0x20   :  { %336 = vmatmul.msk.f32.gmra.mxu1 %vm51_vm0, %v28_v9 }
  0x7e   :  { %v118_v37 = vpop.permute.xlu1 %117 }
  0x7f   :  { %vm119_vm5 = vcmp.eq.s32.totalorder %v118_v37, 1 }
  0x80   :  { %vm123_vm7 = vmand %vm119_vm5, %vm122_vm4 }
  0x81   :  { %vm124_vm9 = vmor %vm123_vm7, %vm110_vm8 }
  0x86   :  { %v196_v43 = vpop.permute.xlu1 %195 }
  0x87   :  { %vm197_vm12 = vcmp.eq.s32.totalorder %v196_v43, 1 }
  0x88   :  { %vm201_vm13 = vmand %vm197_vm12, %vm200_vm11 }
  0x89   :  { %vm202_vm14 = vmor %vm201_vm13, %vm110_vm8 }
  0x8e   :  { %v75_v12 = vpop.f32.mrf.mxu0 }
  0x8f   :  { %v76_v13 = vadd.f32 %v75_v12, %v47_v11 }
  0x91   :  { %126 = vrot.lane.b32.xlu0 %v76_v13, %s387_s23  ;;  %v104_v27 = vmul.f32 0.125, %v76_v13 }
  0x95   :  { %v98_v50 = vpop.f32.mrf.mxu1 }
  0x96   :  { %v78_v14 = vpop.f32.mrf.mxu0  ;;  %v99_v52 = vadd.f32 %v98_v50, %v48_v51 }
  0x97   :  { %v79_v15 = vadd.f32 %v78_v14, %v47_v11 }
  0x98   :  { %182 = vmatpush.msra.mxu3 %v99_v52 }
  0x99   :  { %204 = vrot.lane.b32.xlu0 %v79_v15, %s387_s23  ;;  %v105_v29 = vmul.f32 0.125, %v79_v15 }
  0x9a   :  { %292 = vmatpush.msrb.mxu3 %v273_v1 }
  0x9c   :  { %293 = vmatpush.msrb.mxu3 %v272_v2 }
  0x9d   :  { %v101_v53 = vpop.f32.mrf.mxu1 }
  0x9e   :  { %v102_v54 = vadd.f32 %v101_v53, %v48_v51  ;;  %294 = vmatpush.msrb.mxu3 %v271_v3 }
  0xa0   :  { %295 = vmatpush.msrb.mxu3 %v270_v4 }
  0xa2   :  { %296 = vmatpush.msrb.mxu3 %v269_v5 }
  0xa4   :  { %297 = vmatpush.msrb.mxu3 %v268_v6 }
  0xa6   :  { %298 = vmatpush.msrb.mxu3 %v267_v7 }
  0xa8   :  { %299 = vmatpush.msrb.mxu3 %v266_v8 }
 0x103   :  { %v127_v26 = vpop.permute.xlu0 %126 }
 0x104   :  { %337 = vmatpush.xpose.msk.msra.mxu2 %vm51_vm0, %v127_v26 }
 0x107   :  { %338 = vmatmul.msk.f32.vlgmr.msra.gmra.mxu2 %vm51_vm0, %v104_v27 }
 0x10b   :  { %v205_v28 = vpop.permute.xlu0 %204 }
 0x10c   :  { %340 = vmatpush.xpose.msk.msrb.mxu2 %vm51_vm0, %v205_v28 }
 0x10f   :  { %341 = vmatmul.msk.f32.vlgmr.msrb.gmra.mxu2 %vm51_vm0, %v105_v29 }
 0x110   :  { %259 = vmatpush.msra.mxu2 %v102_v54 }
 0x18a   :  { %v150_v44 = vpop.f32.mrf.mxu2 }
 0x18b   :  { %v153_v45 = vsel %vm124_vm9, %v150_v44, -1e+30 }
 0x18c   :  { %v155_v46 = vsel %vm154_vm10, %v153_v45, -inf }
 0x18d   :  { %156 = vmax.xlane.f32.xlu2 %v155_v46 }
 0x192   :  { %v228_v47 = vpop.f32.mrf.mxu2 }
 0x193   :  { %v231_v48 = vsel %vm202_vm14, %v228_v47, -1e+30 }
 0x194   :  { %v232_v49 = vsel %vm154_vm10, %v231_v48, -inf }
 0x195   :  { %233 = vmax.xlane.f32.xlu2 %v232_v49 }
 0x200   :  { %v157_v55 = vpop.xlane.xlu2 %156 }
 0x201   :  { %v158_v56 = vsub.f32 %v153_v45, %v157_v55 }
 0x203   :  { %v159_v57 = vmul.f32 1.442695, %v158_v56 }
 0x205   :  { %353 = vpow2.f32 %v159_v57 }
 0x208   :  { %v234_v58 = vpop.xlane.xlu2 %233 }
 0x209   :  { %v235_v59 = vsub.f32 %v231_v48, %v234_v58 }
 0x20b   :  { %v354_v60 = vpop.eup %353  ;;  %v236_v61 = vmul.f32 1.442695, %v235_v59 }
 0x20c   :  { %339 = vmatmul.msk.f32.vlgmr.msra.gmra.mxu3 %vm154_vm10, %v354_v60  ;;  %v161_v62 = vsel %vm154_vm10, %v354_v60, 0.0 }
 0x20d   :  { %355 = vpow2.f32 %v236_v61  ;;  %162 = vadd.xlane.f32.xlu0 %v161_v62 }
 0x213   :  { %v356_v63 = vpop.eup %355 }
 0x214   :  { %342 = vmatmul.msk.f32.vlgmr.msra.gmra.mxu2 %vm154_vm10, %v356_v63  ;;  %v238_v0 = vsel %vm154_vm10, %v356_v63, 0.0 }
 0x215   :  { %239 = vadd.xlane.f32.xlu1 %v238_v0 }
 0x280   :  { %v163_v9 = vpop.xlane.xlu0 %162 }
 0x281   :  { %357 = vrcp.f32 %v163_v9 }
 0x287   :  { %v358_v11 = vpop.eup %357 }
 0x288   :  { %v240_v10 = vpop.xlane.xlu1 %239 }
 0x289   :  { %359 = vrcp.f32 %v240_v10 }
 0x28f   :  { %v184_v12 = vpop.f32.mrf.mxu3  ;;  %v360_v14 = vpop.eup %359 }
 0x290   :  { %v188_v13 = vmul.f32 %v358_v11, %v184_v12 }
 0x292   :  { %343 = vmatmul.msk.f32.vlgmr.msrb.gmra.mxu3 %vm51_vm0, %v188_v13 }
 0x297   :  { %v261_v15 = vpop.f32.mrf.mxu2 }
 0x298   :  { %v265_v16 = vmul.f32 %v360_v14, %v261_v15 }
 0x29a   :  { %344 = vmatmul.msk.f32.gmra.mxu3 %vm51_vm0, %v265_v16 }
 0x315   :  { %v301_v18 = vpop.f32.mrf.mxu3 }
 0x316   :  { %v302_v19 = vadd.f32 %v352_v17, %v301_v18 }
 0x318   :  { %vm307_vm15 = vcmp.gt.f32.partialorder %v302_v19, 0.0  ;;  %v309_v20 = vmul.f32 0.1, %v302_v19 }
 0x31a   :  { %v311_v21 = vsel %vm307_vm15, %v302_v19, %v309_v20 }
 0x31b   :  { %313 = vst.msk [vmem:[#allocation2] sm:$0xff] %vm51_vm0, %v311_v21 }
 0x31d   :  { %v304_v22 = vpop.f32.mrf.mxu3 }
 0x31e   :  { %v305_v23 = vadd.f32 %v352_v17, %v304_v22 }
 0x320   :  { %vm308_vm1 = vcmp.gt.f32.partialorder %v305_v23, 0.0  ;;  %v310_v24 = vmul.f32 0.1, %v305_v23 }
 0x322   :  { %v312_v25 = vsel %vm308_vm1, %v305_v23, %v310_v24 }
 0x323   :  { %314 = vst.msk [vmem:[#allocation2 + $0x8] sm:$0xff] %vm51_vm0, %v312_v25 }
 0x324   :  { %327 = dma.vmem_to_hbm [thread:$0]  %s320_s12, 256, %s322_s15, [#allocation3], %s390_s4, %s390_s4, %s391_s16  }
 0x325   :  { %385 = dma.done.wait [#allocation3], 256  }
 0x326   :  { %386 = vsyncadd [#allocation3], 4294967040 }
 0x327   :  { %332 = vsyncpa [#allocation3], 1 }

// kernel: global_information_extractor.4
= control target key start
LH: loop header
LB: loop body
LE: loop exit
PB: predicated region body
PF: predicated region fallthrough
CT: control target
= control target key end

     0   :  { %s2626_s0 = inlined_call_operand.vmem [shape: f32[2,8,256], index: 0, kind: input, shape index: {}]   ;;  %s2627_s1 = inlined_call_operand.vmem [shape: f32[2,32,128], index: 1, kind: input, shape index: {}]   ;;  %s2628_s2 = inlined_call_operand.vmem [shape: f32[2,2,32], index: 2, kind: input, shape index: {}]   ;;  %s2629_s3 = inlined_call_operand.vmem [shape: f32[2,2,32], index: 3, kind: input, shape index: {}]   ;;  %s2630_s4 = inlined_call_operand.vmem [shape: f32[2,2,8,32], index: 4, kind: output, shape index: {0}]   ;;  %s2631_s5 = inlined_call_operand.hbm [shape: f32[2,2,32], index: 5, kind: output, shape index: {1}]   ;;  %s2632_s6 = inlined_call_operand.hbm [shape: f32[2,2,32], index: 6, kind: output, shape index: {2}]  }
   0x1   :  { %2633 = sst [smem:[#allocation11_spill]] %s2626_s0 }
   0x2   :  { %2634 = sst [smem:[#allocation12_spill]] %s2627_s1 }
   0x3   :  { %12 = vsyncpa [#allocation6], 0 }
   0x4   :  { %14 = vsyncpa [#allocation6 + $0x1], 0 }
   0x5   :  { %15 = vsyncpa [#allocation8], 0 }
   0x6   :  { %17 = vsyncpa [#allocation8 + $0x1], 0  ;;  %s2131_s21 = smov 0   ;;  %s2133_s22 = smov 0  }
   0x7   :  { %s2135_s23 = smov 0   ;;  %s2137_s24 = smov 0  }
   0x8   :  { %s2139_s25 = smov 0   ;;  %s2141_s26 = smov 0  }
   0x9 LB: > { %s1742_s27 = sadd.s32 4294967295, %s2091_s26   ;;  %s1743_s28 = sadd.s32 4294967294, %s2091_s26   ;;  %s2091_s26 = sphi %s2141_s26, %s23_s26   ;;  %s2087_s25 = sphi %s2139_s25, %s2645_s25   ;;  %s2083_s24 = sphi %s2137_s24, %s2644_s24   ;;  %s2079_s23 = sphi %s2135_s23, %s2643_s23   ;;  %s2075_s22 = sphi %s2133_s22, %s2642_s22   ;;  %s2071_s21 = sphi %s2131_s21, %s2641_s21  }
   0xa   : > { %s35_s29 = sadd.s32 1, %s2087_s25  ;;  %s52_s30 = sadd.s32 1, %s2079_s23 }
   0xb   : > { %p37_p0 = scmp.ge.s32.totalorder %s35_s29, 2  ;;  %p59_p1 = scmp.ne.s32.totalorder %s2079_s23, %s2075_s22 }
   0xc   : > { %p60_p2 = scmp.eq.s32.totalorder %s2091_s26, 0  ;;  %p203_p3 = scmp.eq.s32.totalorder %s1742_s27, 1 }
   0xd   : > { %s2647_s29 = smov (%p37_p0, %s35_s29), 0  ;;  %p208_p6 = scmp.ne.s32.totalorder %s2075_s22, %s2071_s21 }
   0xe   : > { %p61_p4 = por %p60_p2, %p59_p1  ;;  %p2170_p5 = por %p203_p3, %p59_p1 }
   0xf   : > { %s48_s8 = ssub.s32 %s2087_s25, %s2647_s29  ;;  %p209_p8 = scmp.eq.s32.totalorder %s1743_s28, 1 }
  0x10   : > { %p50_p7 = scmp.eq.s32.totalorder %s48_s8, 0  ;;  %p1745_p10 = scmp.ge.s32.totalorder %s2091_s26, 2 }
  0x11   : > { %p2181_p9 = por %p209_p8, %p208_p6 }
  0x12   : > { %s2179_s9 = scalar_select %p50_p7, %s2079_s23, %s52_s30  }
  0x13   : > { %251 = sbr.rel (%p1745_p10) target bundleno = 36 (0x24), region = 16 }
  0x18   : > { %254 = sbr.rel (!%p61_p4) target bundleno = 36 (0x24), region = 20  ;;  %s256_s11 = sand.u32 (%p61_p4), 1, %s2079_s23  }
  0x19   : > { %s1747_s12 = sshll.u32 (%p61_p4), %s2087_s25, 3  ;;  %s1746_s13 = sshll.u32 (%p61_p4), %s256_s11, 4 }
  0x1a   : > { %s2637_s0 = sld [smem:[#allocation11_spill]] (%p61_p4)  ;;  %s258_s17 = scalar_lea.vmem (%p61_p4), [#allocation4], %s1746_s13 }
  0x20   : > { %s266_s16 = scalar_lea.vmem %s2637_s0, %s1747_s12 }
  0x21   : > { %v297_v0 = vld [vmem:[%s266_s16] sm:$0xff]  ;;  %v299_v1 = vld [vmem:[%s266_s16 + $0x10] sm:$0xff] }
  0x22   : > { %298 = vst [vmem:[%s258_s17] sm:$0xff] %v297_v0 }
  0x23   : > { %300 = vst [vmem:[%s258_s17 + $0x8] sm:$0xff] %v299_v1 }
  0x24 PF: > { %p1748_p11 = scmp.ge.s32.totalorder %s2091_s26, 1  ;;  %p327_p12 = scmp.lt.s32.totalorder %s2091_s26, 3 }
  0x26   : > { %p328_p13 = pnand %p1748_p11, %p327_p12 }
  0x27   : > { %p397_p0 = scmp.lt.s32.totalorder (!%p328_p13), %s2083_s24, 1  ;;  %s2638_s1 = sld [smem:[#allocation12_spill]] (!%p328_p13) }
  0x28   : > { %331 = sbr.rel (%p328_p13) target bundleno = 4749 (0x128d), region = 70  ;;  %s2093_s16 = smov (!%p328_p13), 32  }
  0x29   : > { %s2214_s17 = sand.u32 (!%p328_p13), 1, %s2075_s22   ;;  %p426_p1 = scmp.eq.s32.totalorder (!%p328_p13), %s2083_s24, 0 }
  0x2a   : > { %s2094_s28 = smov (!%p328_p13), 64   ;;  %s1750_s8 = sshll.u32 (!%p328_p13), %s2214_s17, 1 }
  0x2b   : > { %s2536_s11 = scalar_lea.vmem (!%p328_p13), [#allocation7], %s1750_s8 }
  0x2d   : > { %s2197_s18 = scalar_select %p397_p0, %s2083_s24, 1  ;;  %vm432_vm0 = vcmask 254976   ;;  %vm455_vm1 = vcmask 261120   ;;  %vm576_vm11 = vcmask 1041409  }
  0x2f   : > { %s1788_s19 = sshll.u32 %s2197_s18, 5  ;;  %s1754_s20 = sshll.u32 %s2197_s18, 1 }
  0x30   : > { %s401_s30 = scalar_lea.vmem %s2638_s1, %s1788_s19  ;;  %s405_s12 = scalar_lea.vmem %s2628_s2, %s1754_s20 }
  0x31   : > { %s409_s15 = scalar_lea.vmem %s2629_s3, %s1754_s20  ;;  %v431_v2 = vld [vmem:[%s405_s12] sm:$0x3]  ;;  %v439_v3 = vld [vmem:[%s401_s30 + $0x18] sm:$0xff]  ;;  %v438_v4 = vld [vmem:[%s401_s30 + $0x10] sm:$0xff]  ;;  %s1749_s19 = sshll.u32 %s2214_s17, 4 }
  0x32   : > { %433 = vst.msk [vmem:[#allocation2] sm:$0x3] %vm432_vm0, %v431_v2  ;;  %v434_v5 = vld [vmem:[%s409_s15] sm:$0x3]  ;;  %471 = vmatpush.msra.mxu0 %v439_v3  ;;  %594 = vmatpush.msra.mxu1 %v439_v3  ;;  %v437_v6 = vld [vmem:[%s401_s30 + $0x8] sm:$0xff]  ;;  %s336_s27 = scalar_lea.vmem [#allocation4], %s1749_s19 }
  0x33   : > { %435 = vst.msk [vmem:[#allocation3] sm:$0x3] %vm432_vm0, %v434_v5  ;;  %714 = vmatpush.msra.mxu2 %v439_v3  ;;  %836 = vmatpush.msra.mxu3 %v439_v3  ;;  %v436_v7 = vld [vmem:[%s401_s30] sm:$0xff]  ;;  %s444_s20 = scalar_select %p426_p1, 1, 0 }
  0x34   : > { %472 = vmatpush.msra.mxu0 %v438_v4  ;;  %595 = vmatpush.msra.mxu1 %v438_v4  ;;  %v2218_v11 = vld [vmem:[%s336_s27 + $0x8] sm:$0xff]  ;;  %v2225_v15 = vld [vmem:[%s336_s27] sm:$0xff]  ;;  %s2095_s30 = smov 96   ;;  %s1789_s12 = sshll.u32 %s2197_s18, 4 }
  0x35   : > { %715 = vmatpush.msra.mxu2 %v438_v4  ;;  %837 = vmatpush.msra.mxu3 %v438_v4  ;;  %v445_v12 = vstv %s444_s20  ;;  %v450_v13 = vrot.slane %v2218_v11, 7  ;;  %v449_v19 = vrot.slane %v2225_v15, 7  ;;  %s2558_s15 = scalar_lea.vmem %s2630_s4, %s1789_s12  ;;  %s1516_s19 = scalar_lea.sflag [#allocation6], %s2214_s17 }
  0x36   : > { %473 = vmatpush.msra.mxu0 %v437_v6  ;;  %596 = vmatpush.msra.mxu1 %v437_v6  ;;  %vm2221_vm2 = vcmp.eq.s32.totalorder %v445_v12, 1 }
  0x37   : > { %716 = vmatpush.msra.mxu2 %v437_v6  ;;  %838 = vmatpush.msra.mxu3 %v437_v6  ;;  %v2230_v16 = vsel %vm2221_vm2, %v2218_v11, %v450_v13  ;;  %v2237_v21 = vsel %vm2221_vm2, %v2225_v15, %v449_v19 }
  0x38   : > { %474 = vmatpush.msra.mxu0 %v436_v7  ;;  %597 = vmatpush.msra.mxu1 %v436_v7 }
  0x39   : > { %v442_v8 = vld [vmem:[#allocation2] sm:$0x3]  ;;  %717 = vmatpush.msra.mxu2 %v436_v7  ;;  %839 = vmatpush.msra.mxu3 %v436_v7 }
  0x3a   : > { %1758 = vmatmul.msk.f32.vlgmr.msra.gmra.mxu0 %vm455_vm1, %v442_v8  ;;  %v443_v9 = vld [vmem:[#allocation3] sm:$0x3]  ;;  %1068 = vmatpush.msrb.mxu1 %v439_v3  ;;  %v568_v8 = vrot.slane %v2218_v11, 5 }
  0x3b   : > { %v526_v10 = vrot.slane %v443_v9, 1  ;;  %952 = vmatpush.msrb.mxu0 %v439_v3  ;;  %1184 = vmatpush.msrb.mxu2 %v439_v3 }
  0x3c   : > { %1069 = vmatpush.msrb.mxu1 %v438_v4  ;;  %1300 = vmatpush.msrb.mxu3 %v439_v3 }
  0x3d   : > { %529 = vrot.lane.b32.xlu1 %v526_v10, %s2093_s16  ;;  %953 = vmatpush.msrb.mxu0 %v438_v4  ;;  %v2266_v10 = vsel %vm2221_vm2, %v2218_v11, %v568_v8  ;;  %v688_v8 = vrot.slane %v2225_v15, 3 }
  0x3e   : > { %1070 = vmatpush.msrb.mxu1 %v437_v6  ;;  %1185 = vmatpush.msrb.mxu2 %v438_v4 }
  0x3f   : > { %954 = vmatpush.msrb.mxu0 %v437_v6  ;;  %1301 = vmatpush.msrb.mxu3 %v438_v4 }
  0x40   : > { %1071 = vmatpush.msrb.mxu1 %v436_v7  ;;  %1186 = vmatpush.msrb.mxu2 %v437_v6 }
  0x41   : > { %955 = vmatpush.msrb.mxu0 %v436_v7  ;;  %1302 = vmatpush.msrb.mxu3 %v437_v6 }
  0x42   : > { %1187 = vmatpush.msrb.mxu2 %v436_v7 }
  0x43   : > { %1303 = vmatpush.msrb.mxu3 %v436_v7 }
  0x45   : > { %527 = vrot.lane.b32.xlu1 %v443_v9, %s2093_s16  ;;  %v567_v9 = vrot.slane %v2225_v15, 5 }
  0x47   : > { %v2271_v12 = vsel %vm2221_vm2, %v2225_v15, %v567_v9  ;;  %v689_v9 = vrot.slane %v2218_v11, 3 }
  0xaf   : > { %v530_v55 = vpop.permute.xlu1 %529 }
  0xb7   : > { %v476_v17 = vpop.f32.mrf.mxu0  ;;  %v528_v59 = vpop.permute.xlu1 %527 }
  0xb8   : > { %v480_v18 = vrot.slane %v476_v17, 1  ;;  %v483_v22 = vadd.f32 %v476_v17, %v2237_v21 }
  0xba   : > { %v484_v20 = vadd.f32 %v480_v18, %v2230_v16  ;;  %v1759_v26 = vmul.f32 -1.442695, %v483_v22 }
  0xbc   : > { %1853 = vtanh.f32 %v484_v20  ;;  %v1760_v25 = vmul.f32 -1.442695, %v484_v20 }
  0xbd   : > { %1855 = vtanh.f32 %v483_v22 }
  0xbe   : > { %1857 = vpow2.f32 %v1760_v25 }
  0xbf   : > { %1859 = vpow2.f32 %v1759_v26 }
  0xc2   : > { %v1854_v23 = vpop.eup %1853 }
  0xc3   : > { %539 = vrot.lane.b32.xlu0 %v1854_v23, %s2093_s16  ;;  %v1856_v24 = vpop.eup %1855 }
  0xc4   : > { %v1858_v27 = vpop.eup %1857 }
  0xc5   : > { %v492_v28 = vadd.f32 1.0, %v1858_v27  ;;  %v1860_v29 = vpop.eup %1859 }
  0xc6   : > { %v491_v30 = vadd.f32 1.0, %v1860_v29 }
  0xc7   : > { %1861 = vrcp.f32 %v492_v28  ;;  %v519_v39 = vand.u32 2147483648, %v492_v28  ;;  %vm513_vm4 = vweird.f32 %v492_v28  ;;  %v517_v40 = vand.u32 2147483647, %v492_v28 }
  0xc8   : > { %1863 = vrcp.f32 %v491_v30  ;;  %v504_v48 = vand.u32 2147483648, %v491_v30  ;;  %vm498_vm8 = vweird.f32 %v491_v30  ;;  %v502_v49 = vand.u32 2147483647, %v491_v30 }
  0xc9   : > { %v520_v43 = vor.u32 1.1754944e-38, %v519_v39  ;;  %vm518_vm6 = vcmp.eq.f32.partialorder %v517_v40, 8.507059e+37 }
  0xca   : > { %v505_v51 = vor.u32 1.1754944e-38, %v504_v48  ;;  %vm503_vm10 = vcmp.eq.f32.partialorder %v502_v49, 8.507059e+37 }
  0xcb   : > { %537 = vrot.lane.b32.xlu0 %v1856_v24, %s2093_s16 }
  0xcd   : > { %v1862_v31 = vpop.eup %1861 }
  0xce   : > { %v509_v32 = vmul.f32 %v1862_v31, %v492_v28  ;;  %v1864_v34 = vpop.eup %1863  ;;  %vm514_vm3 = vweird.f32 %v1862_v31 }
  0xcf   : > { %v494_v36 = vmul.f32 %v1864_v34, %v491_v30  ;;  %vm515_vm5 = vmor %vm513_vm4, %vm514_vm3  ;;  %vm499_vm7 = vweird.f32 %v1864_v34 }
  0xd0   : > { %v510_v33 = vsub.f32 1.0, %v509_v32  ;;  %vm500_vm9 = vmor %vm498_vm8, %vm499_vm7 }
  0xd1   : > { %v495_v38 = vsub.f32 1.0, %v494_v36 }
  0xd2   : > { %v511_v35 = vmul.f32 %v1862_v31, %v510_v33 }
  0xd3   : > { %v496_v42 = vmul.f32 %v1864_v34, %v495_v38 }
  0xd4   : > { %v512_v37 = vadd.f32 %v1862_v31, %v511_v35 }
  0xd5   : > { %v497_v46 = vadd.f32 %v1864_v34, %v496_v42 }
  0xd6   : > { %v516_v41 = vsel %vm515_vm5, %v1862_v31, %v512_v37 }
  0xd7   : > { %v521_v44 = vsel %vm518_vm6, %v520_v43, %v516_v41  ;;  %v501_v50 = vsel %vm500_vm9, %v1864_v34, %v497_v46 }
  0xd8   : > { %v506_v52 = vsel %vm503_vm10, %v505_v51, %v501_v50  ;;  %v534_v56 = vmul.f32 %v530_v55, %v521_v44 }
  0xd9   : > { %v533_v60 = vmul.f32 %v528_v59, %v506_v52 }
 0x135   : > { %v540_v45 = vpop.permute.xlu0 %539 }
 0x136   : > { %v544_v47 = vmul.f32 %v540_v45, %v521_v44 }
 0x138   : > { %549 = vrot.lane.b32.xlu2 %v544_v47, %s2093_s16 }
 0x13d   : > { %v538_v53 = vpop.permute.xlu0 %537 }
 0x13e   : > { %v543_v54 = vmul.f32 %v538_v53, %v506_v52 }
 0x140   : > { %547 = vrot.lane.b32.xlu2 %v543_v54, %s2093_s16 }
 0x192   : > { %v550_v57 = vpop.permute.xlu2 %549 }
 0x193   : > { %v2244_v58 = vadd.f32 %v550_v57, %v534_v56 }
 0x195   : > { %1865 = vtanh.f32 %v2244_v58  ;;  %v651_v59 = vrot.slane %v2244_v58, 7 }
 0x19a   : > { %v548_v61 = vpop.permute.xlu2 %547 }
 0x19b   : > { %v1866_v62 = vpop.eup %1865  ;;  %v2247_v63 = vadd.f32 %v548_v61, %v533_v60 }
 0x19c   : > { %561 = vrot.lane.b32.xlu0 %v1866_v62, %s2093_s16 }
 0x19d   : > { %1867 = vtanh.f32 %v2247_v63  ;;  %v650_v53 = vrot.slane %v2247_v63, 7 }
 0x1a3   : > { %v1868_v0 = vpop.eup %1867 }
 0x1a4   : > { %559 = vrot.lane.b32.xlu1 %v1868_v0, %s2093_s16 }
 0x20e   : > { %v562_v1 = vpop.permute.xlu0 %561 }
 0x20f   : > { %v2252_v2 = vmul.f32 %v562_v1, %v521_v44 }
 0x211   : > { %v575_v4 = vrot.slane %v2252_v2, 7 }
 0x216   : > { %v560_v3 = vpop.permute.xlu1 %559 }
 0x217   : > { %v2255_v5 = vmul.f32 %v560_v3, %v506_v52 }
 0x219   : > { %v577_v6 = vsel %vm576_vm11, %v575_v4, %v2255_v5 }
 0x21a   : > { %578 = vrot.lane.b32.xlu2 %v577_v6, %s2094_s28 }
 0x274   : > { %v579_v7 = vpop.permute.xlu2 %578 }
 0x275   : > { %1761 = vmatmul.msk.f32.vlgmr.msra.gmra.mxu1 %vm455_vm1, %v579_v7 }
 0x2f2   : > { %v599_v13 = vpop.f32.mrf.mxu1 }
 0x2f3   : > { %v603_v17 = vrot.slane %v599_v13, 7  ;;  %v607_v18 = vadd.f32 %v599_v13, %v2266_v10  ;;  %v2303_v13 = vsel %vm2221_vm2, %v2225_v15, %v688_v8 }
 0x2f5   : > { %v606_v19 = vadd.f32 %v603_v17, %v2271_v12  ;;  %1869 = vtanh.f32 %v607_v18  ;;  %v1763_v23 = vmul.f32 -1.442695, %v607_v18  ;;  %v2308_v17 = vsel %vm2221_vm2, %v2218_v11, %v689_v9 }
 0x2f7   : > { %1871 = vtanh.f32 %v606_v19  ;;  %v1762_v24 = vmul.f32 -1.442695, %v606_v19 }
 0x2f8   : > { %1873 = vpow2.f32 %v1763_v23 }
 0x2f9   : > { %1875 = vpow2.f32 %v1762_v24 }
 0x2fb   : > { %v1870_v20 = vpop.eup %1869 }
 0x2fc   : > { %660 = vrot.lane.b32.xlu1 %v1870_v20, %s2093_s16 }
 0x2fd   : > { %v1872_v22 = vpop.eup %1871 }
 0x2fe   : > { %658 = vrot.lane.b32.xlu0 %v1872_v22, %s2093_s16  ;;  %v1874_v25 = vpop.eup %1873 }
 0x2ff   : > { %v1876_v26 = vpop.eup %1875  ;;  %v615_v27 = vadd.f32 1.0, %v1874_v25 }
 0x300   : > { %v614_v28 = vadd.f32 1.0, %v1876_v26 }
 0x301   : > { %1877 = vrcp.f32 %v615_v27  ;;  %v642_v38 = vand.u32 2147483648, %v615_v27  ;;  %vm636_vm13 = vweird.f32 %v615_v27  ;;  %v640_v39 = vand.u32 2147483647, %v615_v27 }
 0x302   : > { %1879 = vrcp.f32 %v614_v28  ;;  %v627_v42 = vand.u32 2147483648, %v614_v28  ;;  %vm621_vm0 = vweird.f32 %v614_v28  ;;  %v625_v44 = vand.u32 2147483647, %v614_v28 }
 0x303   : > { %v643_v43 = vor.u32 1.1754944e-38, %v642_v38  ;;  %vm641_vm3 = vcmp.eq.f32.partialorder %v640_v39, 8.507059e+37 }
 0x304   : > { %v628_v49 = vor.u32 1.1754944e-38, %v627_v42  ;;  %vm626_vm5 = vcmp.eq.f32.partialorder %v625_v44, 8.507059e+37 }
 0x307   : > { %v1878_v29 = vpop.eup %1877 }
 0x308   : > { %v1880_v30 = vpop.eup %1879  ;;  %v632_v31 = vmul.f32 %v1878_v29, %v615_v27  ;;  %vm637_vm12 = vweird.f32 %v1878_v29 }
 0x309   : > { %v617_v32 = vmul.f32 %v1880_v30, %v614_v28  ;;  %vm638_vm14 = vmor %vm636_vm13, %vm637_vm12  ;;  %vm622_vm15 = vweird.f32 %v1880_v30 }
 0x30a   : > { %v633_v33 = vsub.f32 1.0, %v632_v31  ;;  %vm623_vm4 = vmor %vm621_vm0, %vm622_vm15 }
 0x30b   : > { %v618_v34 = vsub.f32 1.0, %v617_v32 }
 0x30c   : > { %v634_v35 = vmul.f32 %v1878_v29, %v633_v33 }
 0x30d   : > { %v619_v36 = vmul.f32 %v1880_v30, %v618_v34 }
 0x30e   : > { %v635_v37 = vadd.f32 %v1878_v29, %v634_v35 }
 0x30f   : > { %v620_v40 = vadd.f32 %v1880_v30, %v619_v36 }
 0x310   : > { %v639_v41 = vsel %vm638_vm14, %v1878_v29, %v635_v37 }
 0x311   : > { %v644_v46 = vsel %vm641_vm3, %v643_v43, %v639_v41  ;;  %v624_v47 = vsel %vm623_vm4, %v1880_v30, %v620_v40 }
 0x312   : > { %v629_v51 = vsel %vm626_vm5, %v628_v49, %v624_v47  ;;  %v655_v60 = vmul.f32 %v651_v59, %v644_v46 }
 0x313   : > { %v654_v54 = vmul.f32 %v650_v53, %v629_v51 }
 0x36e   : > { %v661_v45 = vpop.permute.xlu1 %660 }
 0x36f   : > { %v665_v48 = vmul.f32 %v661_v45, %v644_v46 }
 0x370   : > { %v659_v50 = vpop.permute.xlu0 %658 }
 0x371   : > { %670 = vrot.lane.b32.xlu0 %v665_v48, %s2093_s16  ;;  %v664_v52 = vmul.f32 %v659_v50, %v629_v51 }
 0x373   : > { %668 = vrot.lane.b32.xlu2 %v664_v52, %s2093_s16 }
 0x3cd   : > { %v669_v55 = vpop.permute.xlu2 %668 }
 0x3ce   : > { %v2280_v56 = vadd.f32 %v669_v55, %v654_v54 }
 0x3d0   : > { %1881 = vtanh.f32 %v2280_v56 }
 0x3d6   : > { %v1882_v57 = vpop.eup %1881 }
 0x3d7   : > { %680 = vrot.lane.b32.xlu1 %v1882_v57, %s2093_s16 }
 0x3e3   : > { %v671_v61 = vpop.permute.xlu0 %670 }
 0x3e4   : > { %v2285_v62 = vadd.f32 %v671_v61, %v655_v60 }
 0x3e6   : > { %1883 = vtanh.f32 %v2285_v62  ;;  %v772_v57 = vrot.slane %v2285_v62, 7 }
 0x3ec   : > { %v1884_v0 = vpop.eup %1883 }
 0x3ed   : > { %682 = vrot.lane.b32.xlu2 %v1884_v0, %s2093_s16 }
 0x447   : > { %v683_v63 = vpop.permute.xlu2 %682 }
 0x448   : > { %v2291_v4 = vmul.f32 %v683_v63, %v644_v46  ;;  %v771_v63 = vrot.slane %v2280_v56, 7 }
 0x449   : > { %v681_v1 = vpop.permute.xlu1 %680 }
 0x44a   : > { %v2289_v3 = vmul.f32 %v681_v1, %v629_v51 }
 0x44c   : > { %v696_v6 = vrot.slane %v2289_v3, 1 }
 0x44e   : > { %v697_v58 = vsel %vm576_vm11, %v2291_v4, %v696_v6 }
 0x44f   : > { %698 = vrot.lane.b32.xlu0 %v697_v58, %s2094_s28 }
 0x4c1   : > { %v699_v7 = vpop.permute.xlu0 %698 }
 0x4c2   : > { %1764 = vmatmul.msk.f32.vlgmr.msra.gmra.mxu2 %vm455_vm1, %v699_v7 }
 0x545   : > { %v719_v18 = vpop.f32.mrf.mxu2 }
 0x546   : > { %v723_v19 = vrot.slane %v719_v18, 6  ;;  %v724_v20 = vrot.slane %v719_v18, 7 }
 0x548   : > { %v727_v22 = vadd.f32 %v723_v19, %v2303_v13  ;;  %v728_v23 = vadd.f32 %v724_v20, %v2308_v17 }
 0x54a   : > { %1885 = vtanh.f32 %v727_v22  ;;  %v1766_v26 = vmul.f32 -1.442695, %v728_v23  ;;  %v1765_v30 = vmul.f32 -1.442695, %v727_v22 }
 0x54b   : > { %1887 = vtanh.f32 %v728_v23  ;;  %v809_v23 = vrot.slane %v2225_v15, 1 }
 0x54c   : > { %1889 = vpow2.f32 %v1766_v26 }
 0x550   : > { %v1886_v24 = vpop.eup %1885 }
 0x551   : > { %v1888_v25 = vpop.eup %1887  ;;  %779 = vrot.lane.b32.xlu1 %v1886_v24, %s2093_s16  ;;  %v810_v24 = vrot.slane %v2218_v11, 1 }
 0x552   : > { %781 = vrot.lane.b32.xlu2 %v1888_v25, %s2093_s16  ;;  %v1890_v27 = vpop.eup %1889  ;;  %v2340_v25 = vsel %vm2221_vm2, %v2225_v15, %v809_v23 }
 0x553   : > { %v736_v28 = vadd.f32 1.0, %v1890_v27  ;;  %v2345_v26 = vsel %vm2221_vm2, %v2218_v11, %v810_v24 }
 0x555   : > { %1891 = vrcp.f32 %v736_v28  ;;  %v763_v37 = vand.u32 2147483648, %v736_v28  ;;  %vm757_vm7 = vweird.f32 %v736_v28  ;;  %v761_v38 = vand.u32 2147483647, %v736_v28 }
 0x556   : > { %1893 = vpow2.f32 %v1765_v30 }
 0x557   : > { %v764_v40 = vor.u32 1.1754944e-38, %v763_v37  ;;  %vm762_vm9 = vcmp.eq.f32.partialorder %v761_v38, 8.507059e+37 }
 0x55b   : > { %v1892_v29 = vpop.eup %1891 }
 0x55c   : > { %v753_v31 = vmul.f32 %v1892_v29, %v736_v28  ;;  %v1894_v33 = vpop.eup %1893  ;;  %vm758_vm6 = vweird.f32 %v1892_v29 }
 0x55d   : > { %v735_v35 = vadd.f32 1.0, %v1894_v33  ;;  %vm759_vm8 = vmor %vm757_vm7, %vm758_vm6 }
 0x55e   : > { %v754_v32 = vsub.f32 1.0, %v753_v31 }
 0x55f   : > { %1895 = vrcp.f32 %v735_v35  ;;  %v748_v49 = vand.u32 2147483648, %v735_v35  ;;  %vm742_vm12 = vweird.f32 %v735_v35  ;;  %v746_v50 = vand.u32 2147483647, %v735_v35 }
 0x560   : > { %v755_v34 = vmul.f32 %v1892_v29, %v754_v32 }
 0x561   : > { %v749_v52 = vor.u32 1.1754944e-38, %v748_v49  ;;  %vm747_vm14 = vcmp.eq.f32.partialorder %v746_v50, 8.507059e+37 }
 0x562   : > { %v756_v36 = vadd.f32 %v1892_v29, %v755_v34 }
 0x564   : > { %v760_v39 = vsel %vm759_vm8, %v1892_v29, %v756_v36 }
 0x565   : > { %v765_v42 = vsel %vm762_vm9, %v764_v40, %v760_v39  ;;  %v1896_v43 = vpop.eup %1895 }
 0x566   : > { %v738_v45 = vmul.f32 %v1896_v43, %v735_v35  ;;  %vm743_vm10 = vweird.f32 %v1896_v43  ;;  %v776_v59 = vmul.f32 %v772_v57, %v765_v42 }
 0x567   : > { %vm744_vm13 = vmor %vm742_vm12, %vm743_vm10 }
 0x568   : > { %v739_v46 = vsub.f32 1.0, %v738_v45 }
 0x56a   : > { %v740_v47 = vmul.f32 %v1896_v43, %v739_v46 }
 0x56c   : > { %v741_v48 = vadd.f32 %v1896_v43, %v740_v47 }
 0x56e   : > { %v745_v51 = vsel %vm744_vm13, %v1896_v43, %v741_v48 }
 0x56f   : > { %v750_v54 = vsel %vm747_vm14, %v749_v52, %v745_v51 }
 0x570   : > { %v775_v1 = vmul.f32 %v771_v63, %v750_v54 }
 0x5ac   : > { %v782_v41 = vpop.permute.xlu2 %781 }
 0x5ad   : > { %v786_v44 = vmul.f32 %v782_v41, %v765_v42 }
 0x5af   : > { %791 = vrot.lane.b32.xlu1 %v786_v44, %s2093_s16 }
 0x5c3   : > { %v780_v53 = vpop.permute.xlu1 %779 }
 0x5c4   : > { %v785_v55 = vmul.f32 %v780_v53, %v750_v54 }
 0x5c6   : > { %789 = vrot.lane.b32.xlu0 %v785_v55, %s2093_s16 }
 0x621   : > { %v792_v60 = vpop.permute.xlu1 %791 }
 0x622   : > { %v2317_v61 = vadd.f32 %v792_v60, %v776_v59 }
 0x624   : > { %1897 = vtanh.f32 %v2317_v61 }
 0x62a   : > { %v1898_v0 = vpop.eup %1897 }
 0x62b   : > { %803 = vrot.lane.b32.xlu0 %v1898_v0, %s2093_s16 }
 0x638   : > { %v790_v6 = vpop.permute.xlu0 %789 }
 0x639   : > { %v2322_v58 = vadd.f32 %v790_v6, %v775_v1 }
 0x63b   : > { %1899 = vtanh.f32 %v2322_v58  ;;  %v893_v6 = vrot.slane %v2322_v58, 7 }
 0x641   : > { %v1900_v7 = vpop.eup %1899 }
 0x642   : > { %801 = vrot.lane.b32.xlu2 %v1900_v7, %s2093_s16  ;;  %v894_v7 = vrot.slane %v2317_v61, 7 }
 0x69c   : > { %v802_v62 = vpop.permute.xlu2 %801 }
 0x69d   : > { %v804_v8 = vpop.permute.xlu0 %803  ;;  %v2326_v9 = vmul.f32 %v802_v62, %v750_v54 }
 0x69e   : > { %v2328_v18 = vmul.f32 %v804_v8, %v765_v42 }
 0x69f   : > { %v817_v19 = vrot.slane %v2326_v9, 2 }
 0x6a0   : > { %v818_v20 = vrot.slane %v2328_v18, 1 }
 0x6a2   : > { %v819_v56 = vsel %vm576_vm11, %v818_v20, %v817_v19 }
 0x6a3   : > { %820 = vrot.lane.b32.xlu1 %v819_v56, %s2094_s28 }
 0x715   : > { %v821_v22 = vpop.permute.xlu1 %820 }
 0x716   : > { %1767 = vmatmul.msk.f32.vlgmr.msra.gmra.mxu3 %vm455_vm1, %v821_v22 }
 0x799   : > { %v841_v27 = vpop.f32.mrf.mxu3 }
 0x79a   : > { %v845_v28 = vrot.slane %v841_v27, 5  ;;  %v846_v29 = vrot.slane %v841_v27, 6 }
 0x79c   : > { %v849_v30 = vadd.f32 %v845_v28, %v2340_v25  ;;  %v850_v31 = vadd.f32 %v846_v29, %v2345_v26 }
 0x79e   : > { %1901 = vtanh.f32 %v849_v30  ;;  %v1768_v15 = vmul.f32 -1.442695, %v849_v30  ;;  %v1769_v36 = vmul.f32 -1.442695, %v850_v31 }
 0x79f   : > { %1903 = vtanh.f32 %v850_v31 }
 0x7a0   : > { %1905 = vpow2.f32 %v1768_v15 }
 0x7a4   : > { %v1902_v32 = vpop.eup %1901 }
 0x7a5   : > { %v1904_v33 = vpop.eup %1903  ;;  %901 = vrot.lane.b32.xlu2 %v1902_v32, %s2093_s16 }
 0x7a6   : > { %903 = vrot.lane.b32.xlu0 %v1904_v33, %s2093_s16  ;;  %v1906_v34 = vpop.eup %1905 }
 0x7a7   : > { %v857_v11 = vadd.f32 1.0, %v1906_v34 }
 0x7a9   : > { %1907 = vrcp.f32 %v857_v11  ;;  %v870_v43 = vand.u32 2147483648, %v857_v11  ;;  %vm864_vm0 = vweird.f32 %v857_v11  ;;  %v868_v44 = vand.u32 2147483647, %v857_v11 }
 0x7aa   : > { %1909 = vpow2.f32 %v1769_v36 }
 0x7ab   : > { %v871_v46 = vor.u32 1.1754944e-38, %v870_v43  ;;  %vm869_vm4 = vcmp.eq.f32.partialorder %v868_v44, 8.507059e+37 }
 0x7af   : > { %v1908_v35 = vpop.eup %1907 }
 0x7b0   : > { %v860_v37 = vmul.f32 %v1908_v35, %v857_v11  ;;  %v1910_v40 = vpop.eup %1909  ;;  %vm865_vm15 = vweird.f32 %v1908_v35 }
 0x7b1   : > { %v858_v41 = vadd.f32 1.0, %v1910_v40  ;;  %vm866_vm3 = vmor %vm864_vm0, %vm865_vm15 }
 0x7b2   : > { %v861_v38 = vsub.f32 1.0, %v860_v37 }
 0x7b3   : > { %1911 = vrcp.f32 %v858_v41  ;;  %v885_v55 = vand.u32 2147483648, %v858_v41  ;;  %vm879_vm6 = vweird.f32 %v858_v41  ;;  %v883_v57 = vand.u32 2147483647, %v858_v41 }
 0x7b4   : > { %v862_v39 = vmul.f32 %v1908_v35, %v861_v38 }
 0x7b5   : > { %v886_v60 = vor.u32 1.1754944e-38, %v885_v55  ;;  %vm884_vm8 = vcmp.eq.f32.partialorder %v883_v57, 8.507059e+37 }
 0x7b6   : > { %v863_v42 = vadd.f32 %v1908_v35, %v862_v39 }
 0x7b8   : > { %v867_v45 = vsel %vm866_vm3, %v1908_v35, %v863_v42 }
 0x7b9   : > { %v872_v48 = vsel %vm869_vm4, %v871_v46, %v867_v45  ;;  %v1912_v50 = vpop.eup %1911 }
 0x7ba   : > { %v875_v51 = vmul.f32 %v1912_v50, %v858_v41  ;;  %vm880_vm5 = vweird.f32 %v1912_v50  ;;  %v897_v62 = vmul.f32 %v893_v6, %v872_v48 }
 0x7bb   : > { %vm881_vm7 = vmor %vm879_vm6, %vm880_vm5 }
 0x7bc   : > { %v876_v52 = vsub.f32 1.0, %v875_v51 }
 0x7be   : > { %v877_v53 = vmul.f32 %v1912_v50, %v876_v52 }
 0x7c0   : > { %v878_v54 = vadd.f32 %v1912_v50, %v877_v53 }
 0x7c2   : > { %v882_v59 = vsel %vm881_vm7, %v1912_v50, %v878_v54 }
 0x7c3   : > { %v887_v63 = vsel %vm884_vm8, %v886_v60, %v882_v59 }
 0x7c4   : > { %v898_v8 = vmul.f32 %v894_v7, %v887_v63 }
 0x7ff   : > { %v902_v47 = vpop.permute.xlu2 %901 }
 0x800   : > { %v907_v49 = vmul.f32 %v902_v47, %v872_v48 }
 0x802   : > { %911 = vrot.lane.b32.xlu1 %v907_v49, %s2093_s16 }
 0x818   : > { %v904_v0 = vpop.permute.xlu0 %903 }
 0x819   : > { %v908_v1 = vmul.f32 %v904_v0, %v887_v63 }
 0x81b   : > { %913 = vrot.lane.b32.xlu2 %v908_v1, %s2093_s16 }
 0x874   : > { %v912_v19 = vpop.permute.xlu1 %911 }
 0x875   : > { %v914_v20 = vpop.permute.xlu2 %913  ;;  %v2355_v56 = vadd.f32 %v912_v19, %v897_v62 }
 0x876   : > { %v2357_v22 = vadd.f32 %v914_v20, %v898_v8 }
 0x877   : > { %1913 = vtanh.f32 %v2355_v56  ;;  %v1009_v19 = vrot.slane %v2355_v56, 7 }
 0x878   : > { %1915 = vtanh.f32 %v2357_v22 }
 0x87d   : > { %v1914_v23 = vpop.eup %1913 }
 0x87e   : > { %v1916_v24 = vpop.eup %1915  ;;  %923 = vrot.lane.b32.xlu0 %v1914_v23, %s2093_s16 }
 0x87f   : > { %925 = vrot.lane.b32.xlu1 %v1916_v24, %s2093_s16 }
 0x8f0   : > { %v924_v58 = vpop.permute.xlu0 %923 }
 0x8f1   : > { %v926_v61 = vpop.permute.xlu1 %925  ;;  %v2363_v27 = vmul.f32 %v924_v58, %v872_v48 }
 0x8f2   : > { %v2365_v28 = vmul.f32 %v926_v61, %v887_v63  ;;  %v1010_v61 = vrot.slane %v2357_v22, 7 }
 0x8f3   : > { %v933_v29 = vrot.slane %v2363_v27, 3 }
 0x8f4   : > { %v934_v30 = vrot.slane %v2365_v28, 2 }
 0x8f6   : > { %v935_v31 = vsel %vm576_vm11, %v934_v30, %v933_v29 }
 0x8f7   : > { %936 = vrot.lane.b32.xlu2 %v935_v31, %s2094_s28 }
 0x951   : > { %v937_v32 = vpop.permute.xlu2 %936 }
 0x952   : > { %1770 = vmatmul.msk.f32.vlgmr.msrb.gmra.mxu0 %vm455_vm1, %v937_v32 }
 0x9cf   : > { %v957_v33 = vpop.f32.mrf.mxu0 }
 0x9d0   : > { %v961_v15 = vrot.slane %v957_v33, 4  ;;  %v962_v34 = vrot.slane %v957_v33, 5 }
 0x9d2   : > { %v965_v11 = vadd.f32 %v961_v15, %v2237_v21  ;;  %v966_v35 = vadd.f32 %v962_v34, %v2230_v16 }
 0x9d4   : > { %1917 = vtanh.f32 %v965_v11  ;;  %v1771_v38 = vmul.f32 -1.442695, %v965_v11  ;;  %v1772_v39 = vmul.f32 -1.442695, %v966_v35 }
 0x9d5   : > { %1919 = vtanh.f32 %v966_v35 }
 0x9d6   : > { %1921 = vpow2.f32 %v1771_v38 }
 0x9d7   : > { %1923 = vpow2.f32 %v1772_v39 }
 0x9da   : > { %v1918_v36 = vpop.eup %1917 }
 0x9db   : > { %v1920_v37 = vpop.eup %1919  ;;  %1017 = vrot.lane.b32.xlu0 %v1918_v36, %s2093_s16 }
 0x9dc   : > { %1019 = vrot.lane.b32.xlu1 %v1920_v37, %s2093_s16  ;;  %v1922_v40 = vpop.eup %1921 }
 0x9dd   : > { %v1924_v41 = vpop.eup %1923  ;;  %v973_v42 = vadd.f32 1.0, %v1922_v40 }
 0x9de   : > { %v974_v43 = vadd.f32 1.0, %v1924_v41 }
 0x9df   : > { %1925 = vrcp.f32 %v973_v42  ;;  %v986_v52 = vand.u32 2147483648, %v973_v42  ;;  %vm980_vm12 = vweird.f32 %v973_v42  ;;  %v984_v54 = vand.u32 2147483647, %v973_v42 }
 0x9e0   : > { %1927 = vrcp.f32 %v974_v43  ;;  %v1001_v53 = vand.u32 2147483648, %v974_v43  ;;  %vm995_vm13 = vweird.f32 %v974_v43  ;;  %v999_v55 = vand.u32 2147483647, %v974_v43 }
 0x9e1   : > { %v987_v60 = vor.u32 1.1754944e-38, %v986_v52  ;;  %vm985_vm0 = vcmp.eq.f32.partialorder %v984_v54, 8.507059e+37 }
 0x9e2   : > { %v1002_v0 = vor.u32 1.1754944e-38, %v1001_v53  ;;  %vm1000_vm3 = vcmp.eq.f32.partialorder %v999_v55, 8.507059e+37 }
 0x9e5   : > { %v1926_v21 = vpop.eup %1925 }
 0x9e6   : > { %v1928_v16 = vpop.eup %1927  ;;  %v976_v44 = vmul.f32 %v1926_v21, %v973_v42  ;;  %vm981_vm9 = vweird.f32 %v1926_v21 }
 0x9e7   : > { %v991_v45 = vmul.f32 %v1928_v16, %v974_v43  ;;  %vm996_vm10 = vweird.f32 %v1928_v16  ;;  %vm982_vm14 = vmor %vm980_vm12, %vm981_vm9 }
 0x9e8   : > { %v977_v46 = vsub.f32 1.0, %v976_v44  ;;  %vm997_vm15 = vmor %vm995_vm13, %vm996_vm10 }
 0x9e9   : > { %v992_v47 = vsub.f32 1.0, %v991_v45 }
 0x9ea   : > { %v978_v48 = vmul.f32 %v1926_v21, %v977_v46 }
 0x9eb   : > { %v993_v49 = vmul.f32 %v1928_v16, %v992_v47 }
 0x9ec   : > { %v979_v50 = vadd.f32 %v1926_v21, %v978_v48 }
 0x9ed   : > { %v994_v51 = vadd.f32 %v1928_v16, %v993_v49 }
 0x9ee   : > { %v983_v57 = vsel %vm982_vm14, %v1926_v21, %v979_v50 }
 0x9ef   : > { %v998_v59 = vsel %vm997_vm15, %v1928_v16, %v994_v51  ;;  %v988_v1 = vsel %vm985_vm0, %v987_v60, %v983_v57 }
 0x9f0   : > { %v1003_v7 = vsel %vm1000_vm3, %v1002_v0, %v998_v59  ;;  %v1013_v20 = vmul.f32 %v1009_v19, %v988_v1 }
 0x9f1   : > { %v1014_v29 = vmul.f32 %v1010_v61, %v1003_v7 }
 0xa4d   : > { %v1018_v63 = vpop.permute.xlu0 %1017 }
 0xa4e   : > { %v1020_v6 = vpop.permute.xlu1 %1019  ;;  %v1023_v62 = vmul.f32 %v1018_v63, %v988_v1 }
 0xa4f   : > { %v1024_v8 = vmul.f32 %v1020_v6, %v1003_v7 }
 0xa50   : > { %1027 = vrot.lane.b32.xlu2 %v1023_v62, %s2093_s16 }
 0xa51   : > { %1029 = vrot.lane.b32.xlu0 %v1024_v8, %s2093_s16 }
 0xaaa   : > { %v1028_v23 = vpop.permute.xlu2 %1027 }
 0xaab   : > { %v2379_v24 = vadd.f32 %v1028_v23, %v1013_v20 }
 0xaad   : > { %1929 = vtanh.f32 %v2379_v24 }
 0xab3   : > { %v1930_v58 = vpop.eup %1929 }
 0xab4   : > { %1039 = vrot.lane.b32.xlu1 %v1930_v58, %s2093_s16 }
 0xac3   : > { %v1030_v30 = vpop.permute.xlu0 %1029 }
 0xac4   : > { %v2384_v31 = vadd.f32 %v1030_v30, %v1014_v29 }
 0xac6   : > { %1931 = vtanh.f32 %v2384_v31  ;;  %v1126_v61 = vrot.slane %v2384_v31, 7 }
 0xacc   : > { %v1932_v32 = vpop.eup %1931 }
 0xacd   : > { %1041 = vrot.lane.b32.xlu2 %v1932_v32, %s2093_s16 }
 0xb26   : > { %v1040_v56 = vpop.permute.xlu1 %1039 }
 0xb27   : > { %v1042_v33 = vpop.permute.xlu2 %1041  ;;  %v2388_v15 = vmul.f32 %v1040_v56, %v988_v1 }
 0xb28   : > { %v2390_v34 = vmul.f32 %v1042_v33, %v1003_v7  ;;  %v1125_v33 = vrot.slane %v2379_v24, 7 }
 0xb29   : > { %v1049_v11 = vrot.slane %v2388_v15, 4 }
 0xb2a   : > { %v1050_v35 = vrot.slane %v2390_v34, 3 }
 0xb2c   : > { %v1051_v22 = vsel %vm576_vm11, %v1050_v35, %v1049_v11 }
 0xb2d   : > { %1052 = vrot.lane.b32.xlu0 %v1051_v22, %s2094_s28 }
 0xb9f   : > { %v1053_v36 = vpop.permute.xlu0 %1052 }
 0xba0   : > { %1773 = vmatmul.msk.f32.vlgmr.msrb.gmra.mxu1 %vm455_vm1, %v1053_v36 }
 0xc1d   : > { %v1073_v37 = vpop.f32.mrf.mxu1 }
 0xc1e   : > { %v1077_v38 = vrot.slane %v1073_v37, 3  ;;  %v1078_v39 = vrot.slane %v1073_v37, 4 }
 0xc20   : > { %v1081_v40 = vadd.f32 %v1077_v38, %v2271_v12  ;;  %v1082_v41 = vadd.f32 %v1078_v39, %v2266_v10 }
 0xc22   : > { %1933 = vtanh.f32 %v1081_v40  ;;  %v1775_v21 = vmul.f32 -1.442695, %v1082_v41  ;;  %v1774_v46 = vmul.f32 -1.442695, %v1081_v40 }
 0xc23   : > { %1935 = vtanh.f32 %v1082_v41 }
 0xc24   : > { %1937 = vpow2.f32 %v1775_v21 }
 0xc28   : > { %v1934_v42 = vpop.eup %1933 }
 0xc29   : > { %v1936_v43 = vpop.eup %1935  ;;  %1133 = vrot.lane.b32.xlu1 %v1934_v42, %s2093_s16 }
 0xc2a   : > { %1135 = vrot.lane.b32.xlu2 %v1936_v43, %s2093_s16  ;;  %v1938_v16 = vpop.eup %1937 }
 0xc2b   : > { %v1090_v44 = vadd.f32 1.0, %v1938_v16 }
 0xc2d   : > { %1939 = vrcp.f32 %v1090_v44  ;;  %v1117_v51 = vand.u32 2147483648, %v1090_v44  ;;  %vm1111_vm5 = vweird.f32 %v1090_v44  ;;  %v1115_v52 = vand.u32 2147483647, %v1090_v44 }
 0xc2e   : > { %1941 = vpow2.f32 %v1774_v46 }
 0xc2f   : > { %v1118_v54 = vor.u32 1.1754944e-38, %v1117_v51  ;;  %vm1116_vm7 = vcmp.eq.f32.partialorder %v1115_v52, 8.507059e+37 }
 0xc33   : > { %v1940_v45 = vpop.eup %1939 }
 0xc34   : > { %v1107_v47 = vmul.f32 %v1940_v45, %v1090_v44  ;;  %v1942_v48 = vpop.eup %1941  ;;  %vm1112_vm4 = vweird.f32 %v1940_v45 }
 0xc35   : > { %v1089_v49 = vadd.f32 1.0, %v1942_v48  ;;  %vm1113_vm6 = vmor %vm1111_vm5, %vm1112_vm4 }
 0xc36   : > { %v1108_v12 = vsub.f32 1.0, %v1107_v47 }
 0xc37   : > { %1943 = vrcp.f32 %v1089_v49  ;;  %v1102_v7 = vand.u32 2147483648, %v1089_v49  ;;  %vm1096_vm9 = vweird.f32 %v1089_v49  ;;  %v1100_v62 = vand.u32 2147483647, %v1089_v49 }
 0xc38   : > { %v1109_v10 = vmul.f32 %v1940_v45, %v1108_v12 }
 0xc39   : > { %v1103_v19 = vor.u32 1.1754944e-38, %v1102_v7  ;;  %vm1101_vm12 = vcmp.eq.f32.partialorder %v1100_v62, 8.507059e+37 }
 0xc3a   : > { %v1110_v50 = vadd.f32 %v1940_v45, %v1109_v10 }
 0xc3c   : > { %v1114_v53 = vsel %vm1113_vm6, %v1940_v45, %v1110_v50 }
 0xc3d   : > { %v1119_v57 = vsel %vm1116_vm7, %v1118_v54, %v1114_v53  ;;  %v1944_v59 = vpop.eup %1943 }
 0xc3e   : > { %v1092_v0 = vmul.f32 %v1944_v59, %v1089_v49  ;;  %vm1097_vm8 = vweird.f32 %v1944_v59  ;;  %v1130_v29 = vmul.f32 %v1126_v61, %v1119_v57 }
 0xc3f   : > { %vm1098_vm10 = vmor %vm1096_vm9, %vm1097_vm8 }
 0xc40   : > { %v1093_v63 = vsub.f32 1.0, %v1092_v0 }
 0xc42   : > { %v1094_v1 = vmul.f32 %v1944_v59, %v1093_v63 }
 0xc44   : > { %v1095_v6 = vadd.f32 %v1944_v59, %v1094_v1 }
 0xc46   : > { %v1099_v8 = vsel %vm1098_vm10, %v1944_v59, %v1095_v6 }
 0xc47   : > { %v1104_v23 = vsel %vm1101_vm12, %v1103_v19, %v1099_v8 }
 0xc48   : > { %v1129_v11 = vmul.f32 %v1125_v33, %v1104_v23 }
 0xc84   : > { %v1136_v55 = vpop.permute.xlu2 %1135 }
 0xc85   : > { %v1140_v60 = vmul.f32 %v1136_v55, %v1119_v57 }
 0xc87   : > { %1145 = vrot.lane.b32.xlu1 %v1140_v60, %s2093_s16 }
 0xc9b   : > { %v1134_v20 = vpop.permute.xlu1 %1133 }
 0xc9c   : > { %v1139_v58 = vmul.f32 %v1134_v20, %v1104_v23 }
 0xc9e   : > { %1143 = vrot.lane.b32.xlu0 %v1139_v58, %s2093_s16 }
 0xcf9   : > { %v1146_v30 = vpop.permute.xlu1 %1145 }
 0xcfa   : > { %v2404_v32 = vadd.f32 %v1146_v30, %v1130_v29 }
 0xcfc   : > { %1945 = vtanh.f32 %v2404_v32 }
 0xd02   : > { %v1946_v56 = vpop.eup %1945 }
 0xd03   : > { %1157 = vrot.lane.b32.xlu0 %v1946_v56, %s2093_s16 }
 0xd10   : > { %v1144_v35 = vpop.permute.xlu0 %1143 }
 0xd11   : > { %v2409_v22 = vadd.f32 %v1144_v35, %v1129_v11  ;;  %v1242_v11 = vrot.slane %v2404_v32, 7 }
 0xd13   : > { %1947 = vtanh.f32 %v2409_v22  ;;  %v1241_v33 = vrot.slane %v2409_v22, 7 }
 0xd19   : > { %v1948_v36 = vpop.eup %1947 }
 0xd1a   : > { %1155 = vrot.lane.b32.xlu2 %v1948_v36, %s2093_s16 }
 0xd74   : > { %v1156_v31 = vpop.permute.xlu2 %1155 }
 0xd75   : > { %v1158_v37 = vpop.permute.xlu0 %1157  ;;  %v2413_v38 = vmul.f32 %v1156_v31, %v1104_v23 }
 0xd76   : > { %v2415_v39 = vmul.f32 %v1158_v37, %v1119_v57 }
 0xd77   : > { %v1165_v40 = vrot.slane %v2413_v38, 5 }
 0xd78   : > { %v1166_v41 = vrot.slane %v2415_v39, 4 }
 0xd7a   : > { %v1167_v24 = vsel %vm576_vm11, %v1166_v41, %v1165_v40 }
 0xd7b   : > { %1168 = vrot.lane.b32.xlu1 %v1167_v24, %s2094_s28 }
 0xded   : > { %v1169_v42 = vpop.permute.xlu1 %1168 }
 0xdee   : > { %1776 = vmatmul.msk.f32.vlgmr.msrb.gmra.mxu2 %vm455_vm1, %v1169_v42 }
 0xe71   : > { %v1189_v43 = vpop.f32.mrf.mxu2 }
 0xe72   : > { %v1193_v21 = vrot.slane %v1189_v43, 2  ;;  %v1194_v16 = vrot.slane %v1189_v43, 3 }
 0xe74   : > { %v1197_v44 = vadd.f32 %v1193_v21, %v2303_v13  ;;  %v1198_v45 = vadd.f32 %v1194_v16, %v2308_v17 }
 0xe76   : > { %1949 = vtanh.f32 %v1197_v44  ;;  %v1777_v12 = vmul.f32 -1.442695, %v1197_v44  ;;  %v1778_v50 = vmul.f32 -1.442695, %v1198_v45 }
 0xe77   : > { %1951 = vtanh.f32 %v1198_v45 }
 0xe78   : > { %1953 = vpow2.f32 %v1777_v12 }
 0xe7c   : > { %v1950_v46 = vpop.eup %1949 }
 0xe7d   : > { %v1952_v47 = vpop.eup %1951  ;;  %1249 = vrot.lane.b32.xlu2 %v1950_v46, %s2093_s16 }
 0xe7e   : > { %1251 = vrot.lane.b32.xlu0 %v1952_v47, %s2093_s16  ;;  %v1954_v48 = vpop.eup %1953 }
 0xe7f   : > { %v1205_v10 = vadd.f32 1.0, %v1954_v48 }
 0xe81   : > { %1955 = vrcp.f32 %v1205_v10  ;;  %v1218_v55 = vand.u32 2147483648, %v1205_v10  ;;  %vm1212_vm14 = vweird.f32 %v1205_v10  ;;  %v1216_v57 = vand.u32 2147483647, %v1205_v10 }
 0xe82   : > { %1957 = vpow2.f32 %v1778_v50 }
 0xe83   : > { %v1219_v60 = vor.u32 1.1754944e-38, %v1218_v55  ;;  %vm1217_vm0 = vcmp.eq.f32.partialorder %v1216_v57, 8.507059e+37 }
 0xe87   : > { %v1956_v49 = vpop.eup %1955 }
 0xe88   : > { %v1208_v51 = vmul.f32 %v1956_v49, %v1205_v10  ;;  %v1958_v17 = vpop.eup %1957  ;;  %vm1213_vm13 = vweird.f32 %v1956_v49 }
 0xe89   : > { %v1206_v53 = vadd.f32 1.0, %v1958_v17  ;;  %vm1214_vm15 = vmor %vm1212_vm14, %vm1213_vm13 }
 0xe8a   : > { %v1209_v13 = vsub.f32 1.0, %v1208_v51 }
 0xe8b   : > { %1959 = vrcp.f32 %v1206_v53  ;;  %v1233_v20 = vand.u32 2147483648, %v1206_v53  ;;  %vm1227_vm4 = vweird.f32 %v1206_v53  ;;  %v1231_v23 = vand.u32 2147483647, %v1206_v53 }
 0xe8c   : > { %v1210_v52 = vmul.f32 %v1956_v49, %v1209_v13 }
 0xe8d   : > { %v1234_v61 = vor.u32 1.1754944e-38, %v1233_v20  ;;  %vm1232_vm6 = vcmp.eq.f32.partialorder %v1231_v23, 8.507059e+37 }
 0xe8e   : > { %v1211_v54 = vadd.f32 %v1956_v49, %v1210_v52 }
 0xe90   : > { %v1215_v59 = vsel %vm1214_vm15, %v1956_v49, %v1211_v54  ;;  %vm1465_vm15 = vcmask 1040384  }
 0xe91   : > { %v1220_v63 = vsel %vm1217_vm0, %v1219_v60, %v1215_v59  ;;  %v1960_v6 = vpop.eup %1959  ;;  %vm1468_vm0 = vcmask 1041408  }
 0xe92   : > { %v1223_v7 = vmul.f32 %v1960_v6, %v1206_v53  ;;  %vm1228_vm3 = vweird.f32 %v1960_v6  ;;  %v1245_v35 = vmul.f32 %v1241_v33, %v1220_v63 }
 0xe93   : > { %vm1229_vm5 = vmor %vm1227_vm4, %vm1228_vm3  ;;  %vm1471_vm3 = vcmask 1042432   ;;  %vm1474_vm4 = vcmask 1043456  }
 0xe94   : > { %v1224_v62 = vsub.f32 1.0, %v1223_v7 }
 0xe96   : > { %v1225_v8 = vmul.f32 %v1960_v6, %v1224_v62 }
 0xe98   : > { %v1226_v19 = vadd.f32 %v1960_v6, %v1225_v8 }
 0xe9a   : > { %v1230_v58 = vsel %vm1229_vm5, %v1960_v6, %v1226_v19  ;;  %vm1404_vm5 = vcmask 261127  }
 0xe9b   : > { %v1235_v30 = vsel %vm1232_vm6, %v1234_v61, %v1230_v58  ;;  %vm1477_vm6 = vcmask 1044480  }
 0xe9c   : > { %v1246_v36 = vmul.f32 %v1242_v11, %v1235_v30 }
 0xed7   : > { %v1250_v0 = vpop.permute.xlu2 %1249 }
 0xed8   : > { %v1255_v1 = vmul.f32 %v1250_v0, %v1220_v63 }
 0xeda   : > { %1259 = vrot.lane.b32.xlu1 %v1255_v1, %s2093_s16 }
 0xef0   : > { %v1252_v29 = vpop.permute.xlu0 %1251 }
 0xef1   : > { %v1256_v56 = vmul.f32 %v1252_v29, %v1235_v30 }
 0xef3   : > { %1261 = vrot.lane.b32.xlu2 %v1256_v56, %s2093_s16 }
 0xf4c   : > { %v1260_v31 = vpop.permute.xlu1 %1259 }
 0xf4d   : > { %v1262_v37 = vpop.permute.xlu2 %1261  ;;  %v2430_v40 = vadd.f32 %v1260_v31, %v1245_v35 }
 0xf4e   : > { %v2432_v41 = vadd.f32 %v1262_v37, %v1246_v36 }
 0xf4f   : > { %1961 = vtanh.f32 %v2430_v40  ;;  %v1357_v31 = vrot.slane %v2430_v40, 7  ;;  %v1460_v40 = vrot.slane %v2252_v2, 1 }
 0xf50   : > { %1963 = vtanh.f32 %v2432_v41 }
 0xf55   : > { %v1962_v24 = vpop.eup %1961 }
 0xf56   : > { %v1964_v42 = vpop.eup %1963  ;;  %1271 = vrot.lane.b32.xlu0 %v1962_v24, %s2093_s16 }
 0xf57   : > { %1273 = vrot.lane.b32.xlu1 %v1964_v42, %s2093_s16 }
 0xfc8   : > { %v1272_v22 = vpop.permute.xlu0 %1271 }
 0xfc9   : > { %v1274_v32 = vpop.permute.xlu1 %1273  ;;  %v2438_v43 = vmul.f32 %v1272_v22, %v1220_v63 }
 0xfca   : > { %v2440_v21 = vmul.f32 %v1274_v32, %v1235_v30  ;;  %v1358_v32 = vrot.slane %v2432_v41, 7  ;;  %v1436_v41 = vrot.slane %v2390_v34, 1 }
 0xfcb   : > { %v1281_v16 = vrot.slane %v2438_v43, 6 }
 0xfcc   : > { %v1282_v44 = vrot.slane %v2440_v21, 5 }
 0xfce   : > { %v1283_v45 = vsel %vm576_vm11, %v1282_v44, %v1281_v16 }
 0xfcf   : > { %1284 = vrot.lane.b32.xlu2 %v1283_v45, %s2094_s28 }
0x1029   : > { %v1285_v46 = vpop.permute.xlu2 %1284 }
0x102a   : > { %1779 = vmatmul.msk.f32.vlgmr.msrb.gmra.mxu3 %vm455_vm1, %v1285_v46 }
0x10ad   : > { %v1305_v47 = vpop.f32.mrf.mxu3 }
0x10ae   : > { %v1309_v12 = vrot.slane %v1305_v47, 1  ;;  %v1310_v48 = vrot.slane %v1305_v47, 2 }
0x10b0   : > { %v1313_v10 = vadd.f32 %v1309_v12, %v2340_v25  ;;  %v1314_v49 = vadd.f32 %v1310_v48, %v2345_v26  ;;  %v1459_v12 = vrot.slane %v2255_v5, 1  ;;  %v1454_v48 = vrot.slane %v2291_v4, 3 }
0x10b2   : > { %1965 = vtanh.f32 %v1313_v10  ;;  %v1780_v13 = vmul.f32 -1.442695, %v1313_v10  ;;  %v1781_v52 = vmul.f32 -1.442695, %v1314_v49  ;;  %v1435_v10 = vrot.slane %v2388_v15, 1 }
0x10b3   : > { %1967 = vtanh.f32 %v1314_v49  ;;  %v1453_v49 = vrot.slane %v2289_v3, 3 }
0x10b4   : > { %1969 = vpow2.f32 %v1780_v13  ;;  %v1429_v13 = vrot.slane %v2413_v38, 3 }
0x10b5   : > { %1971 = vpow2.f32 %v1781_v52 }
0x10b8   : > { %v1966_v50 = vpop.eup %1965 }
0x10b9   : > { %v1968_v51 = vpop.eup %1967  ;;  %1365 = vrot.lane.b32.xlu0 %v1966_v50, %s2093_s16  ;;  %v1442_v50 = vrot.slane %v2365_v28, 7 }
0x10ba   : > { %1367 = vrot.lane.b32.xlu1 %v1968_v51, %s2093_s16  ;;  %v1970_v17 = vpop.eup %1969  ;;  %v1441_v51 = vrot.slane %v2363_v27, 7 }
0x10bb   : > { %v1972_v53 = vpop.eup %1971  ;;  %v1321_v54 = vadd.f32 1.0, %v1970_v17  ;;  %v1447_v17 = vrot.slane %v2326_v9, 5 }
0x10bc   : > { %v1322_v55 = vadd.f32 1.0, %v1972_v53  ;;  %v1430_v53 = vrot.slane %v2415_v39, 3 }
0x10bd   : > { %1973 = vrcp.f32 %v1321_v54  ;;  %v1334_v62 = vand.u32 2147483648, %v1321_v54  ;;  %vm1328_vm8 = vweird.f32 %v1321_v54  ;;  %v1332_v19 = vand.u32 2147483647, %v1321_v54 }
0x10be   : > { %1975 = vrcp.f32 %v1322_v55  ;;  %v1349_v8 = vand.u32 2147483648, %v1322_v55  ;;  %vm1343_vm9 = vweird.f32 %v1322_v55  ;;  %v1347_v20 = vand.u32 2147483647, %v1322_v55 }
0x10bf   : > { %v1335_v61 = vor.u32 1.1754944e-38, %v1334_v62  ;;  %vm1333_vm13 = vcmp.eq.f32.partialorder %v1332_v19, 8.507059e+37 }
0x10c0   : > { %v1350_v29 = vor.u32 1.1754944e-38, %v1349_v8  ;;  %vm1348_vm14 = vcmp.eq.f32.partialorder %v1347_v20, 8.507059e+37 }
0x10c3   : > { %v1974_v25 = vpop.eup %1973 }
0x10c4   : > { %v1976_v26 = vpop.eup %1975  ;;  %v1324_v57 = vmul.f32 %v1974_v25, %v1321_v54  ;;  %vm1329_vm11 = vweird.f32 %v1974_v25  ;;  %v1424_v54 = vrot.slane %v2438_v43, 5 }
0x10c5   : > { %v1339_v59 = vmul.f32 %v1976_v26, %v1322_v55  ;;  %vm1344_vm7 = vweird.f32 %v1976_v26  ;;  %vm1330_vm10 = vmor %vm1328_vm8, %vm1329_vm11  ;;  %vm1480_vm11 = vcmask 1045504  }
0x10c6   : > { %v1325_v60 = vsub.f32 1.0, %v1324_v57  ;;  %vm1345_vm12 = vmor %vm1343_vm9, %vm1344_vm7  ;;  %v1446_v57 = vsel %vm2221_vm2, %v2390_v34, %v1442_v50  ;;  %v1433_v34 = vsel %vm2221_vm2, %v2326_v9, %v1429_v13  ;;  %v1428_v9 = vsel %vm2221_vm2, %v2291_v4, %v1282_v44 }
0x10c7   : > { %v1340_v0 = vsub.f32 1.0, %v1339_v59  ;;  %v1445_v59 = vsel %vm2221_vm2, %v2388_v15, %v1441_v51  ;;  %v1451_v15 = vsel %vm2221_vm2, %v2413_v38, %v1447_v17  ;;  %vm1483_vm7 = vcmask 1046528  }
0x10c8   : > { %v1326_v63 = vmul.f32 %v1974_v25, %v1325_v60 }
0x10c9   : > { %v1341_v1 = vmul.f32 %v1976_v26, %v1340_v0  ;;  %v1440_v0 = vsel %vm2221_vm2, %v2365_v28, %v1436_v41  ;;  %v1434_v28 = vsel %vm2221_vm2, %v2328_v18, %v1430_v53 }
0x10ca   : > { %v1327_v6 = vadd.f32 %v1974_v25, %v1326_v63  ;;  %v1439_v63 = vsel %vm2221_vm2, %v2363_v27, %v1435_v10  ;;  %v1427_v27 = vsel %vm2221_vm2, %v2289_v3, %v1424_v54 }
0x10cb   : > { %v1342_v7 = vadd.f32 %v1976_v26, %v1341_v1 }
0x10cc   : > { %v1331_v23 = vsel %vm1330_vm10, %v1974_v25, %v1327_v6 }
0x10cd   : > { %v1346_v58 = vsel %vm1345_vm12, %v1976_v26, %v1342_v7  ;;  %v1336_v56 = vsel %vm1333_vm13, %v1335_v61, %v1331_v23  ;;  %v1448_v26 = vrot.slane %v2328_v18, 5 }
0x10ce   : > { %v1351_v11 = vsel %vm1348_vm14, %v1350_v29, %v1346_v58  ;;  %v1361_v37 = vmul.f32 %v1357_v31, %v1336_v56  ;;  %v1458_v58 = vsel %vm2221_vm2, %v2440_v21, %v1454_v48 }
0x10cf   : > { %v1362_v16 = vmul.f32 %v1358_v32, %v1351_v11  ;;  %v1452_v4 = vsel %vm2221_vm2, %v2415_v39, %v1448_v26  ;;  %v1457_v39 = vsel %vm2221_vm2, %v2438_v43, %v1453_v49 }
0x112b   : > { %v1366_v30 = vpop.permute.xlu0 %1365 }
0x112c   : > { %v1368_v33 = vpop.permute.xlu1 %1367  ;;  %v1371_v35 = vmul.f32 %v1366_v30, %v1336_v56 }
0x112d   : > { %v1372_v36 = vmul.f32 %v1368_v33, %v1351_v11 }
0x112e   : > { %1375 = vrot.lane.b32.xlu2 %v1371_v35, %s2093_s16 }
0x112f   : > { %1377 = vrot.lane.b32.xlu0 %v1372_v36, %s2093_s16 }
0x1188   : > { %v1376_v24 = vpop.permute.xlu2 %1375 }
0x1189   : > { %v1381_v42 = vadd.f32 %v1376_v24, %v1361_v37 }
0x118b   : > { %1977 = vtanh.f32 %v1381_v42 }
0x1191   : > { %v1978_v22 = vpop.eup %1977 }
0x1192   : > { %1387 = vrot.lane.b32.xlu1 %v1978_v22, %s2093_s16 }
0x11a1   : > { %v1378_v45 = vpop.permute.xlu0 %1377 }
0x11a2   : > { %v2458_v46 = vadd.f32 %v1378_v45, %v1362_v16 }
0x11a4   : > { %1979 = vtanh.f32 %v2458_v46  ;;  %v1410_v8 = vrot.slane %v2458_v46, 7 }
0x11aa   : > { %v1980_v47 = vpop.eup %1979 }
0x11ab   : > { %1389 = vrot.lane.b32.xlu2 %v1980_v47, %s2093_s16  ;;  %s1784_s16 = sshll.u32 %s2083_s24, 1 }
0x11ac   : > { %s1538_s27 = scalar_lea.hbm %s2631_s5, %s1784_s16  ;;  %s1552_s24 = scalar_lea.hbm %s2632_s6, %s1784_s16 }
0x11ad   : > { %s1556_s14 = sshll.u32 %s1552_s24, 4  ;;  %s2001_s16 = scalar_lea.hbm %s2631_s5, 4  ;;  %s1557_s14 = int_to_ptr.hbm [resolvable:$true] %s1556_s14 }
0x11b3   : > { %1411 = vrot.lane.b32.xlu2 %v1381_v42, %s2095_s30 }
0x1204   : > { %v1388_v52 = vpop.permute.xlu1 %1387 }
0x1205   : > { %v1390_v55 = vpop.permute.xlu2 %1389  ;;  %v1393_v25 = vmul.f32 %v1388_v52, %v1336_v56 }
0x1206   : > { %v1394_v60 = vmul.f32 %v1390_v55, %v1351_v11 }
0x1207   : > { %v1419_v1 = vrot.slane %v1393_v25, 7  ;;  %1398 = vrot.lane.b32.xlu0 %v1393_v25, %s2094_s28  ;;  %v1463_v43 = vsel %vm2221_vm2, %v1393_v25, %v1459_v12 }
0x1208   : > { %v1397_v6 = vrot.slane %v1394_v60, 7  ;;  %v1464_v56 = vsel %vm2221_vm2, %v1394_v60, %v1460_v40 }
0x1209   : > { %v1422_v7 = vsel %vm2221_vm2, %v2255_v5, %v1419_v1 }
0x120a   : > { %v1423_v18 = vsel %vm2221_vm2, %v2252_v2, %v1397_v6  ;;  %v1466_v38 = vsel %vm1465_vm15, %v1422_v7, %v1427_v27  ;;  %1400 = vrot.lane.b32.xlu1 %v1397_v6, %s2094_s28  ;;  %vm1406_vm2 = vcmask 253952  }
0x120b   : > { %v1467_v3 = vsel %vm1465_vm15, %v1423_v18, %v1428_v9  ;;  %v1469_v5 = vsel %vm1468_vm0, %v1466_v38, %v1433_v34 }
0x120c   : > { %v1470_v44 = vsel %vm1468_vm0, %v1467_v3, %v1434_v28  ;;  %v1472_v62 = vsel %vm1471_vm3, %v1469_v5, %v1439_v63 }
0x120d   : > { %v1412_v19 = vpop.permute.xlu2 %1411  ;;  %v1473_v20 = vsel %vm1471_vm3, %v1470_v44, %v1440_v0  ;;  %v1475_v23 = vsel %vm1474_vm4, %v1472_v62, %v1445_v59 }
0x120e   : > { %1417 = vst.msk [vmem:[#allocation3 - $0x7] sm:$0x80] %vm1404_vm5, %v1412_v19  ;;  %v1476_v61 = vsel %vm1474_vm4, %v1473_v20, %v1446_v57  ;;  %v1478_v29 = vsel %vm1477_vm6, %v1475_v23, %v1451_v15 }
0x120f   : > { %1501 = vst.msk [vmem:[%s2536_s11 - $0x7] sm:$0x80] %vm1404_vm5, %v1412_v19  ;;  %1413 = vrot.lane.b32.xlu0 %v1410_v8, %s2095_s30  ;;  %v1479_v21 = vsel %vm1477_vm6, %v1476_v61, %v1452_v4  ;;  %v1481_v30 = vsel %vm1480_vm11, %v1478_v29, %v1457_v39  ;;  %s1542_s30 = sshll.u32 %s1538_s27, 4  ;;  %s1543_s30 = int_to_ptr.hbm [resolvable:$true] %s1542_s30 }
0x1210   : > { %v1482_v33 = vsel %vm1480_vm11, %v1479_v21, %v1458_v58  ;;  %v1484_v11 = vsel %vm1483_vm7, %v1481_v30, %v1463_v43  ;;  %s1995_s20 = sshra.s32 %s1543_s30, 4  ;;  %s1996_s20 = int_to_ptr.hbm [resolvable:$true] %s1995_s20 }
0x1211   : > { %v1485_v35 = vsel %vm1483_vm7, %v1482_v33, %v1464_v56  ;;  %s1997_s27 = scalar_lea.hbm %s1996_s20, 2  ;;  %p2002_p6 = scmp.lt.s32.totalorder %s1996_s20, %s2631_s5 }
0x1212   : > { %1490 = vrot.lane.b32.xlu2 %v1485_v35, %s2094_s28  ;;  %1488 = vrot.lane.b32.xlu1 %v1484_v11, %s2094_s28  ;;  %s385_s28 = scalar_lea.vmem [#allocation5], %s1750_s8  ;;  %s1554_s8 = sshll.u32 %s2536_s11, 4  ;;  %s1555_s8 = int_to_ptr.vmem [resolvable:$true] %s1554_s8 }
0x1213   : > { %s1540_s18 = sshll.u32 %s385_s28, 4  ;;  %p1998_p2 = scmp.ne.s32.totalorder %s1996_s20, %s1997_s27  ;;  %s1541_s18 = int_to_ptr.vmem [resolvable:$true] %s1540_s18 }
0x1214   : > { %p2003_p7 = scmp.lt.s32.totalorder %s2001_s16, %s1997_s27 }
0x1215   : > { %p1999_p3 = pnand %p1998_p2, %p2170_p5 }
0x1216   : > { %p2004_p8 = por %p2003_p7, %p2002_p6 }
0x1217   : > { %p2000_p4 = pneg %p1999_p3 }
0x1219   : > { %p2005_p11 = pnand %p2004_p8, %p2000_p4 }
0x126c   : > { %v1491_v2 = vpop.permute.xlu2 %1490 }
0x126d   : > { %1495 = vst.msk [vmem:[%s2558_s15 + $0x8] sm:$0xff] %vm455_vm1, %v1491_v2 }
0x1279   : > { %v1399_v14 = vpop.permute.xlu0 %1398 }
0x127a   : > { %1405 = vst.msk [vmem:[#allocation2 - $0x7] sm:$0x80] %vm1404_vm5, %v1399_v14 }
0x127b   : > { %1499 = vst.msk [vmem:[%s385_s28 - $0x7] sm:$0x80] %vm1404_vm5, %v1399_v14 }
0x127c   : > { %v1401_v36 = vpop.permute.xlu1 %1400 }
0x127d   : > { %1407 = vst.msk [vmem:[#allocation2 + $0x1] sm:$0x1] %vm1406_vm2, %v1401_v36 }
0x127e   : > { %1500 = vst.msk [vmem:[%s385_s28 + $0x1] sm:$0x1] %vm1406_vm2, %v1401_v36 }
0x127f   : > { %2008 = shalt.err (!%p2005_p11)
}
0x1280   : > { %1790 = dma.vmem_to_hbm [thread:$0]  (%p2170_p5), %s1541_s18, 32, %s1543_s30, %s1516_s19  }
0x1281   : > { %v1414_v31 = vpop.permute.xlu0 %1413  ;;  %s1521_s0 = scalar_lea.sflag [#allocation8], %s2214_s17  ;;  %s2023_s1 = sshra.s32 %s1557_s14, 4  ;;  %s2024_s1 = int_to_ptr.hbm [resolvable:$true] %s2023_s1 }
0x1282   : > { %1418 = vst.msk [vmem:[#allocation3 + $0x1] sm:$0x1] %vm1406_vm2, %v1414_v31  ;;  %s2025_s28 = scalar_lea.hbm %s2024_s1, 2  ;;  %s2029_s18 = scalar_lea.hbm %s2632_s6, 4 }
0x1283   : > { %1502 = vst.msk [vmem:[%s2536_s11 + $0x1] sm:$0x1] %vm1406_vm2, %v1414_v31  ;;  %p2026_p12 = scmp.ne.s32.totalorder %s2024_s1, %s2025_s28  ;;  %p2030_p1 = scmp.lt.s32.totalorder %s2024_s1, %s2632_s6 }
0x1284   : > { %v1489_v37 = vpop.permute.xlu1 %1488  ;;  %p2031_p2 = scmp.lt.s32.totalorder %s2029_s18, %s2025_s28 }
0x1285   : > { %p2027_p13 = pnand %p2026_p12, %p2170_p5 }
0x1286   : > { %p2032_p3 = por %p2031_p2, %p2030_p1 }
0x1287   : > { %p2028_p0 = pneg %p2027_p13 }
0x1289   : > { %p2033_p4 = pnand %p2032_p3, %p2028_p0 }
0x128b   : > { %2036 = shalt.err (!%p2033_p4)
}
0x128c   : > { %1791 = dma.vmem_to_hbm [thread:$0]  (%p2170_p5), %s1555_s8, 32, %s1557_s14, %s1521_s0   ;;  %1494 = vst.msk [vmem:[%s2558_s15] sm:$0xff] %vm455_vm1, %v1489_v37 }
0x128d PF: > { %s1583_s17 = sand.u32 1, %s2071_s21   ;;  %p1795_p6 = pnand %p1745_p10, %p2181_p9 }
0x128e   : > { %s1584_s11 = scalar_lea.sflag [#allocation6], %s1583_s17 }
0x128f   : > { %p1796_p7 = pneg %p1795_p6 }
0x1291   : > { %2062 = dma.done.wait (%p1796_p7), %s1584_s11, 32  }
0x1292   : > { %2064 = vsyncadd (%p1796_p7), %s1584_s11, 4294967264  ;;  %s1594_s27 = scalar_lea.sflag [#allocation8], %s1583_s17 }
0x1293   : > { %2066 = dma.done.wait (%p1796_p7), %s1594_s27, 32  }
0x1294   : > { %2068 = vsyncadd (%p1796_p7), %s1594_s27, 4294967264  ;;  %s23_s26 = sadd.s32 1, %s2091_s26   ;;  %s2641_s21 = smov %s2075_s22 }
0x1295   : > { %p20_p5 = scmp.ge.s32.totalorder %s23_s26, 4   ;;  %s2642_s22 = smov %s2079_s23 }
0x1296   : > { %s2643_s23 = smov %s2179_s9  ;;  %s2644_s24 = smov %s2087_s25 }
0x1297   : > { %s2645_s25 = smov %s2647_s29  ;;  %22 = sbr.rel (!%p20_p5) target bundleno = 9 (0x9), region = 160 }
0x129c   :  { %1600 = vsyncpa [#allocation6], 1 }
0x129d   :  { %1602 = vsyncpa [#allocation6 + $0x1], 1 }
0x129e   :  { %1603 = vsyncpa [#allocation8], 1 }
0x129f   :  { %1605 = vsyncpa [#allocation8 + $0x1], 1 }

</bundles_post_ra>
